<compile_context>
chip_gen: v7x
topology: tpu7x:2x2x1
jax: 0.10.0
libtpu: 0.0.40
codegen_flags: <defaults>
</compile_context>

<pallas_src>
import math
import functools

import jax
import jax.numpy as jnp
from jax.experimental import pallas as pl
from jax.experimental.pallas import tpu as pltpu


def _l1attn_kernel(q_ref, k_ref, vf_ref, vb_ref, g_ref, bias_ref, o_ref, *,
                   dst_mxlen, h_blk, width, scale, use_softmax):
    """One grid step = one (batch, head-block) slice; all tokens resident in VMEM."""
    q = q_ref[0]                        # [n_tok, h_blk*width]
    k = k_ref[0].astype(jnp.float32)
    vf = vf_ref[0].astype(jnp.float32)
    vb = vb_ref[0].astype(jnp.float32)
    bias = bias_ref[...]                # [n_tok, dst_mxlen] f32 (-1e12 on unused slots)

    hp = jax.lax.Precision.HIGHEST

    # Grid-constant per-slot gather one-hots (exact in f32).
    gs = [g_ref[r] for r in range(dst_mxlen)]             # each [n_tok, n_tok]
    # Gathered keys for every slot, all heads of the block at once (MXU matmuls).
    kg = [jnp.dot(gs[r], k, precision=hp, preferred_element_type=jnp.float32)
          for r in range(dst_mxlen)]                      # each [n_tok, h_blk*width]

    outs = []
    for h in range(h_blk):              # static, small head loop
        sl = slice(h * width, (h + 1) * width)
        q_h = q[:, sl].astype(jnp.float32)

        # L1 attention logits: one lane column per dst slot.
        cols = [jnp.sum(jnp.abs(q_h - kg[r][:, sl]), axis=-1, keepdims=True) * scale
                for r in range(dst_mxlen)]
        ww = jnp.concatenate(cols, axis=-1) if dst_mxlen > 1 else cols[0]
        attn = ww + bias                                   # [n_tok, dst_mxlen]

        if use_softmax:
            # softmax over [attn | 0]; the appended zero column is dropped afterwards.
            m = jnp.maximum(jnp.max(attn, axis=-1, keepdims=True), 0.0)
            e = jnp.exp(attn - m)
            denom = jnp.sum(e, axis=-1, keepdims=True) + jnp.exp(-m)
            attn_sm = e / denom
        else:
            attn_sm = jnp.exp(attn)      # masked slots -> exp(-1e12) == 0

        # Dense per-head attention matrix A[d, s] (zero where no (d, s) edge).
        a_mat = attn_sm[:, 0:1] * gs[0]
        for r in range(1, dst_mxlen):
            a_mat = a_mat + attn_sm[:, r:r + 1] * gs[r]

        # Forward:  vfo[d] = sum_s A[d, s] * Vf[s]   (MXU)
        # Backward: vbo[s] = sum_d A[d, s] * Vb[d]   (MXU)
        vfo = jnp.dot(a_mat, vf[:, sl], precision=hp,
                      preferred_element_type=jnp.float32)
        vbo = jnp.dot(a_mat.T, vb[:, sl], precision=hp,
                      preferred_element_type=jnp.float32)
        outs.append((vfo + vbo).astype(o_ref.dtype))

    # Single lane-dense store for the whole head block.
    o_ref[0] = jnp.concatenate(outs, axis=-1) if h_blk > 1 else outs[0]


def build_sparse_tables(coo, n_tok, dst_mxlen):
    """coo edge list -> (g, bias).  Depends only on (coo, n_tok, dst_mxlen);
    build once per connectivity graph and reuse across forward calls.

    g[r, d, s]  = 1.0 iff the edge (dst=d, src=s) occupies dst slot r, else 0.
    bias[d, r]  = 0.0 for used slots, -1e12 for unused slots.
    """
    dst = coo[:, 0]
    src = coo[:, 1]
    dcnt = coo[:, 2]
    g = jnp.zeros((dst_mxlen, n_tok, n_tok), jnp.float32).at[dcnt, dst, src].set(1.0)
    bias = jnp.full((n_tok, dst_mxlen), -1e12, jnp.float32).at[dst, dcnt].set(0.0)
    return g, bias


def _pick_h_blk(n_heads, width):
    """Fold all heads into the lane dim by default; split on a 128-lane-aligned
    divisor only when the folded block would get very wide (VMEM pressure)."""
    max_lanes = 4096
    if n_heads * width <= max_lanes:
        return n_heads
    for h in range(n_heads - 1, 0, -1):
        if n_heads % h == 0 and (h * width) % 128 == 0 and h * width <= max_lanes:
            return h
    return n_heads


def l1attn_sparse_bidi(vf, vb, q, k, coo, dst_mxlen, src_mxlen, use_softmax=True,
                       tables=None, h_blk=None):
    """JAX/Pallas equivalent of L1AttnSparseBidi.forward.

    vf, vb, q, k : [bs, n_tok, n_heads, width]
    coo          : [cl, 4] int32 rows of (dst, src, dst_cnt, src_cnt)
    returns      : [bs, n_tok, n_heads, width]

    `src_mxlen` is accepted for API parity but unused: the backward direction is
    computed from the dense per-head attention matrix, not the src-slot structure.
    """
    bs, n_tok, n_heads, width = q.shape
    dtype = q.dtype
    del src_mxlen

    if tables is None:
        tables = build_sparse_tables(coo, n_tok, dst_mxlen)
    g, bias = tables

    if h_blk is None:
        h_blk = _pick_h_blk(n_heads, width)
    assert n_heads % h_blk == 0
    assert h_blk == n_heads or (h_blk * width) % 128 == 0
    n_hb = n_heads // h_blk
    hw = h_blk * width

    # [bs, n_tok, n_heads, width] -> [bs, n_tok, n_heads*width]: free reshape,
    # no HBM transpose.
    qf = q.reshape(bs, n_tok, n_heads * width)
    kf = k.reshape(bs, n_tok, n_heads * width)
    vff = vf.reshape(bs, n_tok, n_heads * width)
    vbf = vb.reshape(bs, n_tok, n_heads * width)

    kernel = functools.partial(
        _l1attn_kernel, dst_mxlen=dst_mxlen, h_blk=h_blk, width=width,
        scale=-1.0 / math.sqrt(width), use_softmax=bool(use_softmax))

    # VMEM budget: double-buffered token tiles + tables + in-kernel temporaries.
    itemsize = jnp.dtype(dtype).itemsize
    est = (2 * 5 * n_tok * hw * itemsize            # q, k, vf, vb, out tiles (x2 buffers)
           + 2 * dst_mxlen * n_tok * n_tok * 4      # G tables (worst case double-buffered)
           + 2 * n_tok * dst_mxlen * 4              # bias
           + dst_mxlen * n_tok * hw * 4             # gathered keys per slot
           + 4 * n_tok * n_tok * 4                  # A, A.T, temps
           + 4 * n_tok * hw * 4)                    # per-head temporaries + out concat
    vmem_limit = int(min(64 * 2 ** 20, max(32 * 2 ** 20, 2 * est)))

    def run(constant_mode):
        tok_spec = pl.BlockSpec((1, n_tok, hw), lambda b, hb: (b, 0, hb))
        const_kw = {} if constant_mode is None else dict(pipeline_mode=constant_mode)
        g_spec = pl.BlockSpec((dst_mxlen, n_tok, n_tok), lambda b, hb: (0, 0, 0),
                              **const_kw)
        bias_spec = pl.BlockSpec((n_tok, dst_mxlen), lambda b, hb: (0, 0), **const_kw)
        return pl.pallas_call(
            kernel,
            out_shape=jax.ShapeDtypeStruct((bs, n_tok, n_heads * width), dtype),
            grid=(bs, n_hb),
            in_specs=[tok_spec, tok_spec, tok_spec, tok_spec, g_spec, bias_spec],
            out_specs=tok_spec,
            compiler_params=pltpu.CompilerParams(
                dimension_semantics=("parallel", "parallel"),
                vmem_limit_bytes=vmem_limit),
        )(qf, kf, vff, vbf, g, bias)

    try:
        # Grid-constant tables never need re-fetching: single-buffer them.
        out = run(pl.Buffered(1))
    except Exception:  # pragma: no cover - jax versions without pipeline_mode support
        out = run(None)

    return out.reshape(bs, n_tok, n_heads, width)


def l1attn_sparse_bidi_ref(vf, vb, q, k, coo, dst_mxlen, src_mxlen, use_softmax=True):
    """Pure-JAX port of the PyTorch forward, used as a correctness reference."""
    hp = jax.lax.Precision.HIGHEST
    bs, n_tok, n_heads, width = q.shape
    qq = jnp.transpose(q, (0, 2, 1, 3))
    kk = jnp.transpose(k, (0, 2, 1, 3))
    vvf = jnp.transpose(vf, (0, 2, 1, 3))
    vvb = jnp.transpose(vb, (0, 2, 1, 3))
    qg = qq[:, :, coo[:, 0], :]
    kg = kk[:, :, coo[:, 1], :]
    scale = -1.0 / math.sqrt(width)
    ww = jnp.sum(jnp.abs(qg - kg), -1) * scale
    attn = jnp.full((bs, n_heads, n_tok, dst_mxlen + 1), -1e12, q.dtype)
    attn = attn.at[:, :, coo[:, 0], coo[:, 2]].set(ww)
    if use_softmax:
        attn = attn.at[:, :, :, -1].set(0.0)
        attn_sm = jax.nn.softmax(attn, -1)
    else:
        attn_sm = jnp.exp(attn)
    attn_sm = attn_sm[:, :, :, :-1]
    vfw = jnp.zeros((bs, n_heads, n_tok, dst_mxlen, width), q.dtype)
    vfw = vfw.at[:, :, coo[:, 0], coo[:, 2], :].set(vvf[:, :, coo[:, 1], :])
    vfo = jnp.einsum('bhdr,bhdrw->bdhw', attn_sm, vfw, precision=hp)
    wwp = attn_sm[:, :, coo[:, 0], coo[:, 2]]
    attn_b = jnp.zeros((bs, n_heads, n_tok, src_mxlen), q.dtype)
    attn_b = attn_b.at[:, :, coo[:, 1], coo[:, 3]].set(wwp)
    vbw = jnp.zeros((bs, n_heads, n_tok, src_mxlen, width), q.dtype)
    vbw = vbw.at[:, :, coo[:, 1], coo[:, 3], :].set(vvb[:, :, coo[:, 0], :])
    vbo = jnp.einsum('bhsd,bhsdw->bshw', attn_b, vbw, precision=hp)
    return vfo + vbo


if __name__ == "__main__":
    # Small deterministic example (the module has no learned parameters).
    bs, n_tok, n_heads, width = 2, 8, 2, 16

    key = jax.random.PRNGKey(0)
    kq, kk_, kvf, kvb = jax.random.split(key, 4)
    q = jax.random.normal(kq, (bs, n_tok, n_heads, width), jnp.float32)
    k = jax.random.normal(kk_, (bs, n_tok, n_heads, width), jnp.float32)
    vf = jax.random.normal(kvf, (bs, n_tok, n_heads, width), jnp.float32)
    vb = jax.random.normal(kvb, (bs, n_tok, n_heads, width), jnp.float32)

    # Deterministic sparse connectivity: each dst attends to {d, d+1, d+3} (mod n_tok).
    edges = []
    dcount = [0] * n_tok
    scount = [0] * n_tok
    for d in range(n_tok):
        for s in (d, (d + 1) % n_tok, (d + 3) % n_tok):
            edges.append([d, s, dcount[d], scount[s]])
            dcount[d] += 1
            scount[s] += 1
    coo = jnp.array(edges, dtype=jnp.int32)
    dst_mxlen = max(dcount)
    src_mxlen = max(scount)

    # Build the sparse tables once (hoisted out of the per-call path) and reuse them.
    tables = build_sparse_tables(coo, n_tok, dst_mxlen)

    for use_softmax in (True, False):
        out = l1attn_sparse_bidi(vf, vb, q, k, coo, dst_mxlen, src_mxlen,
                                 use_softmax=use_softmax, tables=tables)
        out = jax.block_until_ready(out)
        ref = l1attn_sparse_bidi_ref(vf, vb, q, k, coo, dst_mxlen, src_mxlen,
                                     use_softmax=use_softmax)
        assert out.shape == (bs, n_tok, n_heads, width)
        err = float(jnp.max(jnp.abs(out - ref)))
        assert jnp.allclose(out, ref, rtol=1e-3, atol=1e-3), \
            f"use_softmax={use_softmax}: max abs err = {err}"

    print("KERNEL_OK")
</pallas_src>

<mosaic_0001>
module attributes {stable_mosaic.version = 11 : i64} {
  func.func @_l1attn_kernel(%arg0: i32, %arg1: i32, %arg2: memref<1x8x32xf32, #tpu.memory_space<vmem>>, %arg3: memref<1x8x32xf32, #tpu.memory_space<vmem>>, %arg4: memref<1x8x32xf32, #tpu.memory_space<vmem>>, %arg5: memref<1x8x32xf32, #tpu.memory_space<vmem>>, %arg6: memref<3x8x8xf32, #tpu.memory_space<vmem>>, %arg7: memref<8x3xf32, #tpu.memory_space<vmem>>, %arg8: memref<1x8x32xf32, #tpu.memory_space<vmem>>) attributes {dimension_semantics = [#tpu.dimension_semantics<parallel>, #tpu.dimension_semantics<parallel>], iteration_bounds = array<i64: 2, 1>, scalar_prefetch = 0 : i64, scratch_operands = 0 : i64, tpu.core_type = #tpu.core_type<tc>, window_params = [{transform_indices = @transform_0, window_bounds = array<i64: 1, 8, 32>}, {transform_indices = @transform_1, window_bounds = array<i64: 1, 8, 32>}, {transform_indices = @transform_2, window_bounds = array<i64: 1, 8, 32>}, {transform_indices = @transform_3, window_bounds = array<i64: 1, 8, 32>}, {pipeline_mode = #tpu.pipeline_mode<synchronous>, transform_indices = @transform_4, window_bounds = array<i64: 3, 8, 8>}, {pipeline_mode = #tpu.pipeline_mode<synchronous>, transform_indices = @transform_5, window_bounds = array<i64: 8, 3>}, {transform_indices = @transform_6, window_bounds = array<i64: 1, 8, 32>}]} {
    %c0 = arith.constant 0 : index
    %c0_0 = arith.constant 0 : index
    %c0_1 = arith.constant 0 : index
    %0 = vector.load %arg2[%c0, %c0_0, %c0_1] : memref<1x8x32xf32, #tpu.memory_space<vmem>>, vector<1x8x32xf32>
    %1 = vector.shape_cast %0 : vector<1x8x32xf32> to vector<8x32xf32>
    %c0_2 = arith.constant 0 : index
    %c0_3 = arith.constant 0 : index
    %c0_4 = arith.constant 0 : index
    %2 = vector.load %arg3[%c0_2, %c0_3, %c0_4] : memref<1x8x32xf32, #tpu.memory_space<vmem>>, vector<1x8x32xf32>
    %3 = vector.shape_cast %2 : vector<1x8x32xf32> to vector<8x32xf32>
    %c0_5 = arith.constant 0 : index
    %c0_6 = arith.constant 0 : index
    %c0_7 = arith.constant 0 : index
    %4 = vector.load %arg4[%c0_5, %c0_6, %c0_7] : memref<1x8x32xf32, #tpu.memory_space<vmem>>, vector<1x8x32xf32>
    %5 = vector.shape_cast %4 : vector<1x8x32xf32> to vector<8x32xf32>
    %c0_8 = arith.constant 0 : index
    %c0_9 = arith.constant 0 : index
    %c0_10 = arith.constant 0 : index
    %6 = vector.load %arg5[%c0_8, %c0_9, %c0_10] : memref<1x8x32xf32, #tpu.memory_space<vmem>>, vector<1x8x32xf32>
    %7 = vector.shape_cast %6 : vector<1x8x32xf32> to vector<8x32xf32>
    %c0_11 = arith.constant 0 : index
    %c0_12 = arith.constant 0 : index
    %8 = vector.load %arg7[%c0_11, %c0_12] : memref<8x3xf32, #tpu.memory_space<vmem>>, vector<8x3xf32>
    %c0_13 = arith.constant 0 : index
    %c0_14 = arith.constant 0 : index
    %c0_15 = arith.constant 0 : index
    %9 = vector.load %arg6[%c0_13, %c0_14, %c0_15] : memref<3x8x8xf32, #tpu.memory_space<vmem>>, vector<1x8x8xf32>
    %10 = vector.shape_cast %9 : vector<1x8x8xf32> to vector<8x8xf32>
    %c1 = arith.constant 1 : index
    %c0_16 = arith.constant 0 : index
    %c0_17 = arith.constant 0 : index
    %11 = vector.load %arg6[%c1, %c0_16, %c0_17] : memref<3x8x8xf32, #tpu.memory_space<vmem>>, vector<1x8x8xf32>
    %12 = vector.shape_cast %11 : vector<1x8x8xf32> to vector<8x8xf32>
    %c2 = arith.constant 2 : index
    %c0_18 = arith.constant 0 : index
    %c0_19 = arith.constant 0 : index
    %13 = vector.load %arg6[%c2, %c0_18, %c0_19] : memref<3x8x8xf32, #tpu.memory_space<vmem>>, vector<1x8x8xf32>
    %14 = vector.shape_cast %13 : vector<1x8x8xf32> to vector<8x8xf32>
    %cst = arith.constant dense<0.000000e+00> : vector<8x32xf32>
    %15 = tpu.matmul %10, %3, %cst {dimension_numbers = #tpu.dot_dimension_numbers<[1], [0], [0], [1], [0, 0, 1, 1], [], []>, precision = #tpu.contract_precision<fp32>} : vector<8x8xf32>, vector<8x32xf32>, vector<8x32xf32> -> vector<8x32xf32>
    %cst_20 = arith.constant dense<0.000000e+00> : vector<8x32xf32>
    %16 = tpu.matmul %12, %3, %cst_20 {dimension_numbers = #tpu.dot_dimension_numbers<[1], [0], [0], [1], [0, 0, 1, 1], [], []>, precision = #tpu.contract_precision<fp32>} : vector<8x8xf32>, vector<8x32xf32>, vector<8x32xf32> -> vector<8x32xf32>
    %cst_21 = arith.constant dense<0.000000e+00> : vector<8x32xf32>
    %17 = tpu.matmul %14, %3, %cst_21 {dimension_numbers = #tpu.dot_dimension_numbers<[1], [0], [0], [1], [0, 0, 1, 1], [], []>, precision = #tpu.contract_precision<fp32>} : vector<8x8xf32>, vector<8x32xf32>, vector<8x32xf32> -> vector<8x32xf32>
    %18 = vector.extract_strided_slice %1 {offsets = [0, 0], sizes = [8, 16], strides = [1, 1]} : vector<8x32xf32> to vector<8x16xf32>
    %19 = vector.extract_strided_slice %15 {offsets = [0, 0], sizes = [8, 16], strides = [1, 1]} : vector<8x32xf32> to vector<8x16xf32>
    %20 = arith.subf %18, %19 : vector<8x16xf32>
    %21 = math.absf %20 : vector<8x16xf32>
    %cst_22 = arith.constant dense<0.000000e+00> : vector<8xf32>
    %22 = vector.multi_reduction <add>, %21, %cst_22 [1] : vector<8x16xf32> to vector<8xf32>
    %23 = vector.shape_cast %22 : vector<8xf32> to vector<8x1xf32>
    %cst_23 = arith.constant -2.500000e-01 : f32
    %24 = vector.broadcast %cst_23 : f32 to vector<8x1xf32>
    %25 = arith.mulf %23, %24 : vector<8x1xf32>
    %26 = vector.extract_strided_slice %16 {offsets = [0, 0], sizes = [8, 16], strides = [1, 1]} : vector<8x32xf32> to vector<8x16xf32>
    %27 = arith.subf %18, %26 : vector<8x16xf32>
    %28 = math.absf %27 : vector<8x16xf32>
    %cst_24 = arith.constant dense<0.000000e+00> : vector<8xf32>
    %29 = vector.multi_reduction <add>, %28, %cst_24 [1] : vector<8x16xf32> to vector<8xf32>
    %30 = vector.shape_cast %29 : vector<8xf32> to vector<8x1xf32>
    %cst_25 = arith.constant -2.500000e-01 : f32
    %31 = vector.broadcast %cst_25 : f32 to vector<8x1xf32>
    %32 = arith.mulf %30, %31 : vector<8x1xf32>
    %33 = vector.extract_strided_slice %17 {offsets = [0, 0], sizes = [8, 16], strides = [1, 1]} : vector<8x32xf32> to vector<8x16xf32>
    %34 = arith.subf %18, %33 : vector<8x16xf32>
    %35 = math.absf %34 : vector<8x16xf32>
    %cst_26 = arith.constant dense<0.000000e+00> : vector<8xf32>
    %36 = vector.multi_reduction <add>, %35, %cst_26 [1] : vector<8x16xf32> to vector<8xf32>
    %37 = vector.shape_cast %36 : vector<8xf32> to vector<8x1xf32>
    %cst_27 = arith.constant -2.500000e-01 : f32
    %38 = vector.broadcast %cst_27 : f32 to vector<8x1xf32>
    %39 = arith.mulf %37, %38 : vector<8x1xf32>
    %40 = tpu.concatenate %25, %32, %39 in 1 : vector<8x1xf32>, vector<8x1xf32>, vector<8x1xf32> -> vector<8x3xf32>
    %41 = arith.addf %40, %8 : vector<8x3xf32>
    %cst_28 = arith.constant dense<0xFF800000> : vector<8xf32>
    %42 = vector.multi_reduction <maximumf>, %41, %cst_28 [1] : vector<8x3xf32> to vector<8xf32>
    %43 = vector.shape_cast %42 : vector<8xf32> to vector<8x1xf32>
    %cst_29 = arith.constant 0.000000e+00 : f32
    %44 = vector.broadcast %cst_29 : f32 to vector<8x1xf32>
    %45 = arith.maximumf %43, %44 : vector<8x1xf32>
    %46 = vector.broadcast %45 : vector<8x1xf32> to vector<8x3xf32>
    %47 = arith.subf %41, %46 : vector<8x3xf32>
    %48 = math.exp %47 : vector<8x3xf32>
    %cst_30 = arith.constant dense<0.000000e+00> : vector<8xf32>
    %49 = vector.multi_reduction <add>, %48, %cst_30 [1] : vector<8x3xf32> to vector<8xf32>
    %50 = vector.shape_cast %49 : vector<8xf32> to vector<8x1xf32>
    %cst_31 = arith.constant 0.000000e+00 : f32
    %51 = vector.broadcast %cst_31 : f32 to vector<8x1xf32>
    %52 = arith.subf %51, %45 : vector<8x1xf32>
    %53 = math.exp %52 : vector<8x1xf32>
    %54 = arith.addf %50, %53 : vector<8x1xf32>
    %55 = vector.broadcast %54 : vector<8x1xf32> to vector<8x3xf32>
    %56 = arith.divf %48, %55 : vector<8x3xf32>
    %57 = vector.extract_strided_slice %56 {offsets = [0, 0], sizes = [8, 1], strides = [1, 1]} : vector<8x3xf32> to vector<8x1xf32>
    %58 = vector.broadcast %57 : vector<8x1xf32> to vector<8x8xf32>
    %59 = arith.mulf %58, %10 : vector<8x8xf32>
    %60 = vector.extract_strided_slice %56 {offsets = [0, 1], sizes = [8, 1], strides = [1, 1]} : vector<8x3xf32> to vector<8x1xf32>
    %61 = vector.broadcast %60 : vector<8x1xf32> to vector<8x8xf32>
    %62 = arith.mulf %61, %12 : vector<8x8xf32>
    %63 = arith.addf %59, %62 : vector<8x8xf32>
    %64 = vector.extract_strided_slice %56 {offsets = [0, 2], sizes = [8, 1], strides = [1, 1]} : vector<8x3xf32> to vector<8x1xf32>
    %65 = vector.broadcast %64 : vector<8x1xf32> to vector<8x8xf32>
    %66 = arith.mulf %65, %14 : vector<8x8xf32>
    %67 = arith.addf %63, %66 : vector<8x8xf32>
    %68 = vector.extract_strided_slice %5 {offsets = [0, 0], sizes = [8, 16], strides = [1, 1]} : vector<8x32xf32> to vector<8x16xf32>
    %cst_32 = arith.constant dense<0.000000e+00> : vector<8x16xf32>
    %69 = tpu.matmul %67, %68, %cst_32 {dimension_numbers = #tpu.dot_dimension_numbers<[1], [0], [0], [1], [0, 0, 1, 1], [], []>, precision = #tpu.contract_precision<fp32>} : vector<8x8xf32>, vector<8x16xf32>, vector<8x16xf32> -> vector<8x16xf32>
    %70 = tpu.transpose %67, [1, 0] : vector<8x8xf32> -> vector<8x8xf32>
    %71 = vector.extract_strided_slice %7 {offsets = [0, 0], sizes = [8, 16], strides = [1, 1]} : vector<8x32xf32> to vector<8x16xf32>
    %cst_33 = arith.constant dense<0.000000e+00> : vector<8x16xf32>
    %72 = tpu.matmul %70, %71, %cst_33 {dimension_numbers = #tpu.dot_dimension_numbers<[1], [0], [0], [1], [0, 0, 1, 1], [], []>, precision = #tpu.contract_precision<fp32>} : vector<8x8xf32>, vector<8x16xf32>, vector<8x16xf32> -> vector<8x16xf32>
    %73 = arith.addf %69, %72 : vector<8x16xf32>
    %74 = vector.extract_strided_slice %1 {offsets = [0, 16], sizes = [8, 16], strides = [1, 1]} : vector<8x32xf32> to vector<8x16xf32>
    %75 = vector.extract_strided_slice %15 {offsets = [0, 16], sizes = [8, 16], strides = [1, 1]} : vector<8x32xf32> to vector<8x16xf32>
    %76 = arith.subf %74, %75 : vector<8x16xf32>
    %77 = math.absf %76 : vector<8x16xf32>
    %cst_34 = arith.constant dense<0.000000e+00> : vector<8xf32>
    %78 = vector.multi_reduction <add>, %77, %cst_34 [1] : vector<8x16xf32> to vector<8xf32>
    %79 = vector.shape_cast %78 : vector<8xf32> to vector<8x1xf32>
    %cst_35 = arith.constant -2.500000e-01 : f32
    %80 = vector.broadcast %cst_35 : f32 to vector<8x1xf32>
    %81 = arith.mulf %79, %80 : vector<8x1xf32>
    %82 = vector.extract_strided_slice %16 {offsets = [0, 16], sizes = [8, 16], strides = [1, 1]} : vector<8x32xf32> to vector<8x16xf32>
    %83 = arith.subf %74, %82 : vector<8x16xf32>
    %84 = math.absf %83 : vector<8x16xf32>
    %cst_36 = arith.constant dense<0.000000e+00> : vector<8xf32>
    %85 = vector.multi_reduction <add>, %84, %cst_36 [1] : vector<8x16xf32> to vector<8xf32>
    %86 = vector.shape_cast %85 : vector<8xf32> to vector<8x1xf32>
    %cst_37 = arith.constant -2.500000e-01 : f32
    %87 = vector.broadcast %cst_37 : f32 to vector<8x1xf32>
    %88 = arith.mulf %86, %87 : vector<8x1xf32>
    %89 = vector.extract_strided_slice %17 {offsets = [0, 16], sizes = [8, 16], strides = [1, 1]} : vector<8x32xf32> to vector<8x16xf32>
    %90 = arith.subf %74, %89 : vector<8x16xf32>
    %91 = math.absf %90 : vector<8x16xf32>
    %cst_38 = arith.constant dense<0.000000e+00> : vector<8xf32>
    %92 = vector.multi_reduction <add>, %91, %cst_38 [1] : vector<8x16xf32> to vector<8xf32>
    %93 = vector.shape_cast %92 : vector<8xf32> to vector<8x1xf32>
    %cst_39 = arith.constant -2.500000e-01 : f32
    %94 = vector.broadcast %cst_39 : f32 to vector<8x1xf32>
    %95 = arith.mulf %93, %94 : vector<8x1xf32>
    %96 = tpu.concatenate %81, %88, %95 in 1 : vector<8x1xf32>, vector<8x1xf32>, vector<8x1xf32> -> vector<8x3xf32>
    %97 = arith.addf %96, %8 : vector<8x3xf32>
    %cst_40 = arith.constant dense<0xFF800000> : vector<8xf32>
    %98 = vector.multi_reduction <maximumf>, %97, %cst_40 [1] : vector<8x3xf32> to vector<8xf32>
    %99 = vector.shape_cast %98 : vector<8xf32> to vector<8x1xf32>
    %cst_41 = arith.constant 0.000000e+00 : f32
    %100 = vector.broadcast %cst_41 : f32 to vector<8x1xf32>
    %101 = arith.maximumf %99, %100 : vector<8x1xf32>
    %102 = vector.broadcast %101 : vector<8x1xf32> to vector<8x3xf32>
    %103 = arith.subf %97, %102 : vector<8x3xf32>
    %104 = math.exp %103 : vector<8x3xf32>
    %cst_42 = arith.constant dense<0.000000e+00> : vector<8xf32>
    %105 = vector.multi_reduction <add>, %104, %cst_42 [1] : vector<8x3xf32> to vector<8xf32>
    %106 = vector.shape_cast %105 : vector<8xf32> to vector<8x1xf32>
    %cst_43 = arith.constant 0.000000e+00 : f32
    %107 = vector.broadcast %cst_43 : f32 to vector<8x1xf32>
    %108 = arith.subf %107, %101 : vector<8x1xf32>
    %109 = math.exp %108 : vector<8x1xf32>
    %110 = arith.addf %106, %109 : vector<8x1xf32>
    %111 = vector.broadcast %110 : vector<8x1xf32> to vector<8x3xf32>
    %112 = arith.divf %104, %111 : vector<8x3xf32>
    %113 = vector.extract_strided_slice %112 {offsets = [0, 0], sizes = [8, 1], strides = [1, 1]} : vector<8x3xf32> to vector<8x1xf32>
    %114 = vector.broadcast %113 : vector<8x1xf32> to vector<8x8xf32>
    %115 = arith.mulf %114, %10 : vector<8x8xf32>
    %116 = vector.extract_strided_slice %112 {offsets = [0, 1], sizes = [8, 1], strides = [1, 1]} : vector<8x3xf32> to vector<8x1xf32>
    %117 = vector.broadcast %116 : vector<8x1xf32> to vector<8x8xf32>
    %118 = arith.mulf %117, %12 : vector<8x8xf32>
    %119 = arith.addf %115, %118 : vector<8x8xf32>
    %120 = vector.extract_strided_slice %112 {offsets = [0, 2], sizes = [8, 1], strides = [1, 1]} : vector<8x3xf32> to vector<8x1xf32>
    %121 = vector.broadcast %120 : vector<8x1xf32> to vector<8x8xf32>
    %122 = arith.mulf %121, %14 : vector<8x8xf32>
    %123 = arith.addf %119, %122 : vector<8x8xf32>
    %124 = vector.extract_strided_slice %5 {offsets = [0, 16], sizes = [8, 16], strides = [1, 1]} : vector<8x32xf32> to vector<8x16xf32>
    %cst_44 = arith.constant dense<0.000000e+00> : vector<8x16xf32>
    %125 = tpu.matmul %123, %124, %cst_44 {dimension_numbers = #tpu.dot_dimension_numbers<[1], [0], [0], [1], [0, 0, 1, 1], [], []>, precision = #tpu.contract_precision<fp32>} : vector<8x8xf32>, vector<8x16xf32>, vector<8x16xf32> -> vector<8x16xf32>
    %126 = tpu.transpose %123, [1, 0] : vector<8x8xf32> -> vector<8x8xf32>
    %127 = vector.extract_strided_slice %7 {offsets = [0, 16], sizes = [8, 16], strides = [1, 1]} : vector<8x32xf32> to vector<8x16xf32>
    %cst_45 = arith.constant dense<0.000000e+00> : vector<8x16xf32>
    %128 = tpu.matmul %126, %127, %cst_45 {dimension_numbers = #tpu.dot_dimension_numbers<[1], [0], [0], [1], [0, 0, 1, 1], [], []>, precision = #tpu.contract_precision<fp32>} : vector<8x8xf32>, vector<8x16xf32>, vector<8x16xf32> -> vector<8x16xf32>
    %129 = arith.addf %125, %128 : vector<8x16xf32>
    %130 = tpu.concatenate %73, %129 in 1 : vector<8x16xf32>, vector<8x16xf32> -> vector<8x32xf32>
    %c0_46 = arith.constant 0 : index
    %c0_47 = arith.constant 0 : index
    %c0_48 = arith.constant 0 : index
    %131 = vector.load %arg8[%c0_46, %c0_47, %c0_48] : memref<1x8x32xf32, #tpu.memory_space<vmem>>, vector<1x8x32xf32>
    %132 = vector.shape_cast %131 : vector<1x8x32xf32> to vector<8x32xf32>
    %133 = vector.shape_cast %130 : vector<8x32xf32> to vector<1x8x32xf32>
    tpu.vector_store %arg8[%c0_46, %c0_47, %c0_48], %133 {strides = array<i32>} : memref<1x8x32xf32, #tpu.memory_space<vmem>>, vector<1x8x32xf32>,
    return
  }
  func.func @transform_0(%arg0: i32, %arg1: i32) -> (i32, i32, i32) {
    %c0_i32 = arith.constant 0 : i32
    %c0_i32_0 = arith.constant 0 : i32
    return %arg0, %c0_i32, %arg1 : i32, i32, i32
  }
  func.func @transform_1(%arg0: i32, %arg1: i32) -> (i32, i32, i32) {
    %c0_i32 = arith.constant 0 : i32
    %c0_i32_0 = arith.constant 0 : i32
    return %arg0, %c0_i32, %arg1 : i32, i32, i32
  }
  func.func @transform_2(%arg0: i32, %arg1: i32) -> (i32, i32, i32) {
    %c0_i32 = arith.constant 0 : i32
    %c0_i32_0 = arith.constant 0 : i32
    return %arg0, %c0_i32, %arg1 : i32, i32, i32
  }
  func.func @transform_3(%arg0: i32, %arg1: i32) -> (i32, i32, i32) {
    %c0_i32 = arith.constant 0 : i32
    %c0_i32_0 = arith.constant 0 : i32
    return %arg0, %c0_i32, %arg1 : i32, i32, i32
  }
  func.func @transform_4(%arg0: i32, %arg1: i32) -> (i32, i32, i32) {
    %c0_i32 = arith.constant 0 : i32
    %c0_i32_0 = arith.constant 0 : i32
    %c0_i32_1 = arith.constant 0 : i32
    %c0_i32_2 = arith.constant 0 : i32
    return %c0_i32, %c0_i32_0, %c0_i32_1 : i32, i32, i32
  }
  func.func @transform_5(%arg0: i32, %arg1: i32) -> (i32, i32) {
    %c0_i32 = arith.constant 0 : i32
    %c0_i32_0 = arith.constant 0 : i32
    %c0_i32_1 = arith.constant 0 : i32
    return %c0_i32, %c0_i32_0 : i32, i32
  }
  func.func @transform_6(%arg0: i32, %arg1: i32) -> (i32, i32, i32) {
    %c0_i32 = arith.constant 0 : i32
    %c0_i32_0 = arith.constant 0 : i32
    return %arg0, %c0_i32, %arg1 : i32, i32, i32
  }
}

module attributes {stable_mosaic.version = 11 : i64} {
  func.func @_l1attn_kernel(%arg0: i32, %arg1: i32, %arg2: memref<1x8x32xf32, #tpu.memory_space<vmem>>, %arg3: memref<1x8x32xf32, #tpu.memory_space<vmem>>, %arg4: memref<1x8x32xf32, #tpu.memory_space<vmem>>, %arg5: memref<1x8x32xf32, #tpu.memory_space<vmem>>, %arg6: memref<3x8x8xf32, #tpu.memory_space<vmem>>, %arg7: memref<8x3xf32, #tpu.memory_space<vmem>>, %arg8: memref<1x8x32xf32, #tpu.memory_space<vmem>>) attributes {dimension_semantics = [#tpu.dimension_semantics<parallel>, #tpu.dimension_semantics<parallel>], iteration_bounds = array<i64: 2, 1>, scalar_prefetch = 0 : i64, scratch_operands = 0 : i64, tpu.core_type = #tpu.core_type<tc>, window_params = [{transform_indices = @transform_0, window_bounds = array<i64: 1, 8, 32>}, {transform_indices = @transform_1, window_bounds = array<i64: 1, 8, 32>}, {transform_indices = @transform_2, window_bounds = array<i64: 1, 8, 32>}, {transform_indices = @transform_3, window_bounds = array<i64: 1, 8, 32>}, {pipeline_mode = #tpu.pipeline_mode<synchronous>, transform_indices = @transform_4, window_bounds = array<i64: 3, 8, 8>}, {pipeline_mode = #tpu.pipeline_mode<synchronous>, transform_indices = @transform_5, window_bounds = array<i64: 8, 3>}, {transform_indices = @transform_6, window_bounds = array<i64: 1, 8, 32>}]} {
    %c0 = arith.constant 0 : index
    %c0_0 = arith.constant 0 : index
    %c0_1 = arith.constant 0 : index
    %0 = vector.load %arg2[%c0, %c0_0, %c0_1] : memref<1x8x32xf32, #tpu.memory_space<vmem>>, vector<1x8x32xf32>
    %1 = vector.shape_cast %0 : vector<1x8x32xf32> to vector<8x32xf32>
    %c0_2 = arith.constant 0 : index
    %c0_3 = arith.constant 0 : index
    %c0_4 = arith.constant 0 : index
    %2 = vector.load %arg3[%c0_2, %c0_3, %c0_4] : memref<1x8x32xf32, #tpu.memory_space<vmem>>, vector<1x8x32xf32>
    %3 = vector.shape_cast %2 : vector<1x8x32xf32> to vector<8x32xf32>
    %c0_5 = arith.constant 0 : index
    %c0_6 = arith.constant 0 : index
    %c0_7 = arith.constant 0 : index
    %4 = vector.load %arg4[%c0_5, %c0_6, %c0_7] : memref<1x8x32xf32, #tpu.memory_space<vmem>>, vector<1x8x32xf32>
    %5 = vector.shape_cast %4 : vector<1x8x32xf32> to vector<8x32xf32>
    %c0_8 = arith.constant 0 : index
    %c0_9 = arith.constant 0 : index
    %c0_10 = arith.constant 0 : index
    %6 = vector.load %arg5[%c0_8, %c0_9, %c0_10] : memref<1x8x32xf32, #tpu.memory_space<vmem>>, vector<1x8x32xf32>
    %7 = vector.shape_cast %6 : vector<1x8x32xf32> to vector<8x32xf32>
    %c0_11 = arith.constant 0 : index
    %c0_12 = arith.constant 0 : index
    %8 = vector.load %arg7[%c0_11, %c0_12] : memref<8x3xf32, #tpu.memory_space<vmem>>, vector<8x3xf32>
    %c0_13 = arith.constant 0 : index
    %c0_14 = arith.constant 0 : index
    %c0_15 = arith.constant 0 : index
    %9 = vector.load %arg6[%c0_13, %c0_14, %c0_15] : memref<3x8x8xf32, #tpu.memory_space<vmem>>, vector<1x8x8xf32>
    %10 = vector.shape_cast %9 : vector<1x8x8xf32> to vector<8x8xf32>
    %c1 = arith.constant 1 : index
    %c0_16 = arith.constant 0 : index
    %c0_17 = arith.constant 0 : index
    %11 = vector.load %arg6[%c1, %c0_16, %c0_17] : memref<3x8x8xf32, #tpu.memory_space<vmem>>, vector<1x8x8xf32>
    %12 = vector.shape_cast %11 : vector<1x8x8xf32> to vector<8x8xf32>
    %c2 = arith.constant 2 : index
    %c0_18 = arith.constant 0 : index
    %c0_19 = arith.constant 0 : index
    %13 = vector.load %arg6[%c2, %c0_18, %c0_19] : memref<3x8x8xf32, #tpu.memory_space<vmem>>, vector<1x8x8xf32>
    %14 = vector.shape_cast %13 : vector<1x8x8xf32> to vector<8x8xf32>
    %cst = arith.constant dense<0.000000e+00> : vector<8x32xf32>
    %15 = tpu.matmul %10, %3, %cst {dimension_numbers = #tpu.dot_dimension_numbers<[1], [0], [0], [1], [0, 0, 1, 1], [], []>, precision = #tpu.contract_precision<fp32>} : vector<8x8xf32>, vector<8x32xf32>, vector<8x32xf32> -> vector<8x32xf32>
    %cst_20 = arith.constant dense<0.000000e+00> : vector<8x32xf32>
    %16 = tpu.matmul %12, %3, %cst_20 {dimension_numbers = #tpu.dot_dimension_numbers<[1], [0], [0], [1], [0, 0, 1, 1], [], []>, precision = #tpu.contract_precision<fp32>} : vector<8x8xf32>, vector<8x32xf32>, vector<8x32xf32> -> vector<8x32xf32>
    %cst_21 = arith.constant dense<0.000000e+00> : vector<8x32xf32>
    %17 = tpu.matmul %14, %3, %cst_21 {dimension_numbers = #tpu.dot_dimension_numbers<[1], [0], [0], [1], [0, 0, 1, 1], [], []>, precision = #tpu.contract_precision<fp32>} : vector<8x8xf32>, vector<8x32xf32>, vector<8x32xf32> -> vector<8x32xf32>
    %18 = vector.extract_strided_slice %1 {offsets = [0, 0], sizes = [8, 16], strides = [1, 1]} : vector<8x32xf32> to vector<8x16xf32>
    %19 = vector.extract_strided_slice %15 {offsets = [0, 0], sizes = [8, 16], strides = [1, 1]} : vector<8x32xf32> to vector<8x16xf32>
    %20 = arith.subf %18, %19 : vector<8x16xf32>
    %21 = math.absf %20 : vector<8x16xf32>
    %cst_22 = arith.constant dense<0.000000e+00> : vector<8xf32>
    %22 = vector.multi_reduction <add>, %21, %cst_22 [1] : vector<8x16xf32> to vector<8xf32>
    %23 = vector.shape_cast %22 : vector<8xf32> to vector<8x1xf32>
    %cst_23 = arith.constant -2.500000e-01 : f32
    %24 = vector.broadcast %cst_23 : f32 to vector<8x1xf32>
    %25 = arith.mulf %23, %24 : vector<8x1xf32>
    %26 = vector.extract_strided_slice %16 {offsets = [0, 0], sizes = [8, 16], strides = [1, 1]} : vector<8x32xf32> to vector<8x16xf32>
    %27 = arith.subf %18, %26 : vector<8x16xf32>
    %28 = math.absf %27 : vector<8x16xf32>
    %cst_24 = arith.constant dense<0.000000e+00> : vector<8xf32>
    %29 = vector.multi_reduction <add>, %28, %cst_24 [1] : vector<8x16xf32> to vector<8xf32>
    %30 = vector.shape_cast %29 : vector<8xf32> to vector<8x1xf32>
    %cst_25 = arith.constant -2.500000e-01 : f32
    %31 = vector.broadcast %cst_25 : f32 to vector<8x1xf32>
    %32 = arith.mulf %30, %31 : vector<8x1xf32>
    %33 = vector.extract_strided_slice %17 {offsets = [0, 0], sizes = [8, 16], strides = [1, 1]} : vector<8x32xf32> to vector<8x16xf32>
    %34 = arith.subf %18, %33 : vector<8x16xf32>
    %35 = math.absf %34 : vector<8x16xf32>
    %cst_26 = arith.constant dense<0.000000e+00> : vector<8xf32>
    %36 = vector.multi_reduction <add>, %35, %cst_26 [1] : vector<8x16xf32> to vector<8xf32>
    %37 = vector.shape_cast %36 : vector<8xf32> to vector<8x1xf32>
    %cst_27 = arith.constant -2.500000e-01 : f32
    %38 = vector.broadcast %cst_27 : f32 to vector<8x1xf32>
    %39 = arith.mulf %37, %38 : vector<8x1xf32>
    %40 = tpu.concatenate %25, %32, %39 in 1 : vector<8x1xf32>, vector<8x1xf32>, vector<8x1xf32> -> vector<8x3xf32>
    %41 = arith.addf %40, %8 : vector<8x3xf32>
    %cst_28 = arith.constant dense<0xFF800000> : vector<8xf32>
    %42 = vector.multi_reduction <maximumf>, %41, %cst_28 [1] : vector<8x3xf32> to vector<8xf32>
    %43 = vector.shape_cast %42 : vector<8xf32> to vector<8x1xf32>
    %cst_29 = arith.constant 0.000000e+00 : f32
    %44 = vector.broadcast %cst_29 : f32 to vector<8x1xf32>
    %45 = arith.maximumf %43, %44 : vector<8x1xf32>
    %46 = vector.broadcast %45 : vector<8x1xf32> to vector<8x3xf32>
    %47 = arith.subf %41, %46 : vector<8x3xf32>
    %48 = math.exp %47 : vector<8x3xf32>
    %cst_30 = arith.constant dense<0.000000e+00> : vector<8xf32>
    %49 = vector.multi_reduction <add>, %48, %cst_30 [1] : vector<8x3xf32> to vector<8xf32>
    %50 = vector.shape_cast %49 : vector<8xf32> to vector<8x1xf32>
    %cst_31 = arith.constant 0.000000e+00 : f32
    %51 = vector.broadcast %cst_31 : f32 to vector<8x1xf32>
    %52 = arith.subf %51, %45 : vector<8x1xf32>
    %53 = math.exp %52 : vector<8x1xf32>
    %54 = arith.addf %50, %53 : vector<8x1xf32>
    %55 = vector.broadcast %54 : vector<8x1xf32> to vector<8x3xf32>
    %56 = arith.divf %48, %55 : vector<8x3xf32>
    %57 = vector.extract_strided_slice %56 {offsets = [0, 0], sizes = [8, 1], strides = [1, 1]} : vector<8x3xf32> to vector<8x1xf32>
    %58 = vector.broadcast %57 : vector<8x1xf32> to vector<8x8xf32>
    %59 = arith.mulf %58, %10 : vector<8x8xf32>
    %60 = vector.extract_strided_slice %56 {offsets = [0, 1], sizes = [8, 1], strides = [1, 1]} : vector<8x3xf32> to vector<8x1xf32>
    %61 = vector.broadcast %60 : vector<8x1xf32> to vector<8x8xf32>
    %62 = arith.mulf %61, %12 : vector<8x8xf32>
    %63 = arith.addf %59, %62 : vector<8x8xf32>
    %64 = vector.extract_strided_slice %56 {offsets = [0, 2], sizes = [8, 1], strides = [1, 1]} : vector<8x3xf32> to vector<8x1xf32>
    %65 = vector.broadcast %64 : vector<8x1xf32> to vector<8x8xf32>
    %66 = arith.mulf %65, %14 : vector<8x8xf32>
    %67 = arith.addf %63, %66 : vector<8x8xf32>
    %68 = vector.extract_strided_slice %5 {offsets = [0, 0], sizes = [8, 16], strides = [1, 1]} : vector<8x32xf32> to vector<8x16xf32>
    %cst_32 = arith.constant dense<0.000000e+00> : vector<8x16xf32>
    %69 = tpu.matmul %67, %68, %cst_32 {dimension_numbers = #tpu.dot_dimension_numbers<[1], [0], [0], [1], [0, 0, 1, 1], [], []>, precision = #tpu.contract_precision<fp32>} : vector<8x8xf32>, vector<8x16xf32>, vector<8x16xf32> -> vector<8x16xf32>
    %70 = tpu.transpose %67, [1, 0] : vector<8x8xf32> -> vector<8x8xf32>
    %71 = vector.extract_strided_slice %7 {offsets = [0, 0], sizes = [8, 16], strides = [1, 1]} : vector<8x32xf32> to vector<8x16xf32>
    %cst_33 = arith.constant dense<0.000000e+00> : vector<8x16xf32>
    %72 = tpu.matmul %70, %71, %cst_33 {dimension_numbers = #tpu.dot_dimension_numbers<[1], [0], [0], [1], [0, 0, 1, 1], [], []>, precision = #tpu.contract_precision<fp32>} : vector<8x8xf32>, vector<8x16xf32>, vector<8x16xf32> -> vector<8x16xf32>
    %73 = arith.addf %69, %72 : vector<8x16xf32>
    %74 = vector.extract_strided_slice %1 {offsets = [0, 16], sizes = [8, 16], strides = [1, 1]} : vector<8x32xf32> to vector<8x16xf32>
    %75 = vector.extract_strided_slice %15 {offsets = [0, 16], sizes = [8, 16], strides = [1, 1]} : vector<8x32xf32> to vector<8x16xf32>
    %76 = arith.subf %74, %75 : vector<8x16xf32>
    %77 = math.absf %76 : vector<8x16xf32>
    %cst_34 = arith.constant dense<0.000000e+00> : vector<8xf32>
    %78 = vector.multi_reduction <add>, %77, %cst_34 [1] : vector<8x16xf32> to vector<8xf32>
    %79 = vector.shape_cast %78 : vector<8xf32> to vector<8x1xf32>
    %cst_35 = arith.constant -2.500000e-01 : f32
    %80 = vector.broadcast %cst_35 : f32 to vector<8x1xf32>
    %81 = arith.mulf %79, %80 : vector<8x1xf32>
    %82 = vector.extract_strided_slice %16 {offsets = [0, 16], sizes = [8, 16], strides = [1, 1]} : vector<8x32xf32> to vector<8x16xf32>
    %83 = arith.subf %74, %82 : vector<8x16xf32>
    %84 = math.absf %83 : vector<8x16xf32>
    %cst_36 = arith.constant dense<0.000000e+00> : vector<8xf32>
    %85 = vector.multi_reduction <add>, %84, %cst_36 [1] : vector<8x16xf32> to vector<8xf32>
    %86 = vector.shape_cast %85 : vector<8xf32> to vector<8x1xf32>
    %cst_37 = arith.constant -2.500000e-01 : f32
    %87 = vector.broadcast %cst_37 : f32 to vector<8x1xf32>
    %88 = arith.mulf %86, %87 : vector<8x1xf32>
    %89 = vector.extract_strided_slice %17 {offsets = [0, 16], sizes = [8, 16], strides = [1, 1]} : vector<8x32xf32> to vector<8x16xf32>
    %90 = arith.subf %74, %89 : vector<8x16xf32>
    %91 = math.absf %90 : vector<8x16xf32>
    %cst_38 = arith.constant dense<0.000000e+00> : vector<8xf32>
    %92 = vector.multi_reduction <add>, %91, %cst_38 [1] : vector<8x16xf32> to vector<8xf32>
    %93 = vector.shape_cast %92 : vector<8xf32> to vector<8x1xf32>
    %cst_39 = arith.constant -2.500000e-01 : f32
    %94 = vector.broadcast %cst_39 : f32 to vector<8x1xf32>
    %95 = arith.mulf %93, %94 : vector<8x1xf32>
    %96 = tpu.concatenate %81, %88, %95 in 1 : vector<8x1xf32>, vector<8x1xf32>, vector<8x1xf32> -> vector<8x3xf32>
    %97 = arith.addf %96, %8 : vector<8x3xf32>
    %cst_40 = arith.constant dense<0xFF800000> : vector<8xf32>
    %98 = vector.multi_reduction <maximumf>, %97, %cst_40 [1] : vector<8x3xf32> to vector<8xf32>
    %99 = vector.shape_cast %98 : vector<8xf32> to vector<8x1xf32>
    %cst_41 = arith.constant 0.000000e+00 : f32
    %100 = vector.broadcast %cst_41 : f32 to vector<8x1xf32>
    %101 = arith.maximumf %99, %100 : vector<8x1xf32>
    %102 = vector.broadcast %101 : vector<8x1xf32> to vector<8x3xf32>
    %103 = arith.subf %97, %102 : vector<8x3xf32>
    %104 = math.exp %103 : vector<8x3xf32>
    %cst_42 = arith.constant dense<0.000000e+00> : vector<8xf32>
    %105 = vector.multi_reduction <add>, %104, %cst_42 [1] : vector<8x3xf32> to vector<8xf32>
    %106 = vector.shape_cast %105 : vector<8xf32> to vector<8x1xf32>
    %cst_43 = arith.constant 0.000000e+00 : f32
    %107 = vector.broadcast %cst_43 : f32 to vector<8x1xf32>
    %108 = arith.subf %107, %101 : vector<8x1xf32>
    %109 = math.exp %108 : vector<8x1xf32>
    %110 = arith.addf %106, %109 : vector<8x1xf32>
    %111 = vector.broadcast %110 : vector<8x1xf32> to vector<8x3xf32>
    %112 = arith.divf %104, %111 : vector<8x3xf32>
    %113 = vector.extract_strided_slice %112 {offsets = [0, 0], sizes = [8, 1], strides = [1, 1]} : vector<8x3xf32> to vector<8x1xf32>
    %114 = vector.broadcast %113 : vector<8x1xf32> to vector<8x8xf32>
    %115 = arith.mulf %114, %10 : vector<8x8xf32>
    %116 = vector.extract_strided_slice %112 {offsets = [0, 1], sizes = [8, 1], strides = [1, 1]} : vector<8x3xf32> to vector<8x1xf32>
    %117 = vector.broadcast %116 : vector<8x1xf32> to vector<8x8xf32>
    %118 = arith.mulf %117, %12 : vector<8x8xf32>
    %119 = arith.addf %115, %118 : vector<8x8xf32>
    %120 = vector.extract_strided_slice %112 {offsets = [0, 2], sizes = [8, 1], strides = [1, 1]} : vector<8x3xf32> to vector<8x1xf32>
    %121 = vector.broadcast %120 : vector<8x1xf32> to vector<8x8xf32>
    %122 = arith.mulf %121, %14 : vector<8x8xf32>
    %123 = arith.addf %119, %122 : vector<8x8xf32>
    %124 = vector.extract_strided_slice %5 {offsets = [0, 16], sizes = [8, 16], strides = [1, 1]} : vector<8x32xf32> to vector<8x16xf32>
    %cst_44 = arith.constant dense<0.000000e+00> : vector<8x16xf32>
    %125 = tpu.matmul %123, %124, %cst_44 {dimension_numbers = #tpu.dot_dimension_numbers<[1], [0], [0], [1], [0, 0, 1, 1], [], []>, precision = #tpu.contract_precision<fp32>} : vector<8x8xf32>, vector<8x16xf32>, vector<8x16xf32> -> vector<8x16xf32>
    %126 = tpu.transpose %123, [1, 0] : vector<8x8xf32> -> vector<8x8xf32>
    %127 = vector.extract_strided_slice %7 {offsets = [0, 16], sizes = [8, 16], strides = [1, 1]} : vector<8x32xf32> to vector<8x16xf32>
    %cst_45 = arith.constant dense<0.000000e+00> : vector<8x16xf32>
    %128 = tpu.matmul %126, %127, %cst_45 {dimension_numbers = #tpu.dot_dimension_numbers<[1], [0], [0], [1], [0, 0, 1, 1], [], []>, precision = #tpu.contract_precision<fp32>} : vector<8x8xf32>, vector<8x16xf32>, vector<8x16xf32> -> vector<8x16xf32>
    %129 = arith.addf %125, %128 : vector<8x16xf32>
    %130 = tpu.concatenate %73, %129 in 1 : vector<8x16xf32>, vector<8x16xf32> -> vector<8x32xf32>
    %c0_46 = arith.constant 0 : index
    %c0_47 = arith.constant 0 : index
    %c0_48 = arith.constant 0 : index
    %131 = vector.load %arg8[%c0_46, %c0_47, %c0_48] : memref<1x8x32xf32, #tpu.memory_space<vmem>>, vector<1x8x32xf32>
    %132 = vector.shape_cast %131 : vector<1x8x32xf32> to vector<8x32xf32>
    %133 = vector.shape_cast %130 : vector<8x32xf32> to vector<1x8x32xf32>
    tpu.vector_store %arg8[%c0_46, %c0_47, %c0_48], %133 {strides = array<i32>} : memref<1x8x32xf32, #tpu.memory_space<vmem>>, vector<1x8x32xf32>,
    return
  }
  func.func @transform_0(%arg0: i32, %arg1: i32) -> (i32, i32, i32) {
    %c0_i32 = arith.constant 0 : i32
    %c0_i32_0 = arith.constant 0 : i32
    return %arg0, %c0_i32, %arg1 : i32, i32, i32
  }
  func.func @transform_1(%arg0: i32, %arg1: i32) -> (i32, i32, i32) {
    %c0_i32 = arith.constant 0 : i32
    %c0_i32_0 = arith.constant 0 : i32
    return %arg0, %c0_i32, %arg1 : i32, i32, i32
  }
  func.func @transform_2(%arg0: i32, %arg1: i32) -> (i32, i32, i32) {
    %c0_i32 = arith.constant 0 : i32
    %c0_i32_0 = arith.constant 0 : i32
    return %arg0, %c0_i32, %arg1 : i32, i32, i32
  }
  func.func @transform_3(%arg0: i32, %arg1: i32) -> (i32, i32, i32) {
    %c0_i32 = arith.constant 0 : i32
    %c0_i32_0 = arith.constant 0 : i32
    return %arg0, %c0_i32, %arg1 : i32, i32, i32
  }
  func.func @transform_4(%arg0: i32, %arg1: i32) -> (i32, i32, i32) {
    %c0_i32 = arith.constant 0 : i32
    %c0_i32_0 = arith.constant 0 : i32
    %c0_i32_1 = arith.constant 0 : i32
    %c0_i32_2 = arith.constant 0 : i32
    return %c0_i32, %c0_i32_0, %c0_i32_1 : i32, i32, i32
  }
  func.func @transform_5(%arg0: i32, %arg1: i32) -> (i32, i32) {
    %c0_i32 = arith.constant 0 : i32
    %c0_i32_0 = arith.constant 0 : i32
    %c0_i32_1 = arith.constant 0 : i32
    return %c0_i32, %c0_i32_0 : i32, i32
  }
  func.func @transform_6(%arg0: i32, %arg1: i32) -> (i32, i32, i32) {
    %c0_i32 = arith.constant 0 : i32
    %c0_i32_0 = arith.constant 0 : i32
    return %arg0, %c0_i32, %arg1 : i32, i32, i32
  }
}

</mosaic_0001>

<bundles_post_ra>
// kernel: tpu_custom_call.1
= control target key start
LH: loop header
LB: loop body
LE: loop exit
PB: predicated region body
PF: predicated region fallthrough
CT: control target
= control target key end

     0   :  { %s5224_s0 = inlined_call_operand.hbm [shape: f32[2,8,32], index: 0, kind: input, shape index: {}]   ;;  %s5225_s1 = inlined_call_operand.hbm [shape: f32[2,8,32], index: 1, kind: input, shape index: {}]   ;;  %s5226_s2 = inlined_call_operand.hbm [shape: f32[2,8,32], index: 2, kind: input, shape index: {}]   ;;  %s5227_s3 = inlined_call_operand.hbm [shape: f32[2,8,32], index: 3, kind: input, shape index: {}]   ;;  %s5228_s4 = inlined_call_operand.vmem [shape: f32[3,8,8], index: 4, kind: input, shape index: {}]   ;;  %s5229_s5 = inlined_call_operand.vmem [shape: f32[8,3], index: 5, kind: input, shape index: {}]   ;;  %s5230_s6 = inlined_call_operand.hbm [shape: f32[2,8,32], index: 6, kind: output, shape index: {}]  }
   0x1   :  { %5242 = sst [smem:[#allocation22_spill]] %s5225_s1 }
   0x2   :  { %11 = vsyncpa [#allocation3], 0 }
   0x3   :  { %13 = vsyncpa [#allocation3 + $0x1], 0 }
   0x4   :  { %14 = vsyncpa [#allocation6], 0 }
   0x5   :  { %16 = vsyncpa [#allocation6 + $0x1], 0 }
   0x6   :  { %17 = vsyncpa [#allocation9], 0 }
   0x7   :  { %19 = vsyncpa [#allocation9 + $0x1], 0 }
   0x8   :  { %20 = vsyncpa [#allocation4], 0 }
   0x9   :  { %22 = vsyncpa [#allocation4 + $0x1], 0  ;;  %s4671_s21 = smov 0   ;;  %s4673_s22 = smov 0  }
   0xa   :  { %s4675_s23 = smov 0   ;;  %s4677_s24 = smov 0  }
   0xb   :  { %s4679_s25 = smov 0   ;;  %s4681_s26 = smov 0  }
   0xc LB: > { %5243 = sst [smem:[#allocation15_spill]] %s4602_s21  ;;  %s4702_s27 = sadd.s32 4294967295, %s4622_s26   ;;  %s4622_s26 = sphi %s4681_s26, %s28_s26   ;;  %s4618_s25 = sphi %s4679_s25, %s5273_s25   ;;  %s4614_s24 = sphi %s4677_s24, %s5272_s24   ;;  %s4610_s23 = sphi %s4675_s23, %s5271_s23   ;;  %s4606_s22 = sphi %s4673_s22, %s5275_s22   ;;  %s4602_s21 = sphi %s4671_s21, %s5274_s21  }
   0xd   : > { %5244 = sst [smem:[#allocation16_spill]] %s4610_s23  ;;  %s3919_s28 = sadd.s32 4294967294, %s4622_s26  }
   0xe   : > { %5245 = sst [smem:[#allocation17_spill]] %s4618_s25  ;;  %s40_s29 = sadd.s32 1, %s4618_s25 }
   0xf   : > { %5246 = sst [smem:[#allocation18_spill]] %s4622_s26  ;;  %s49_s30 = sadd.s32 1, %s4610_s23 }
  0x10   : > { %p42_p0 = scmp.ge.s32.totalorder %s40_s29, 2  ;;  %p56_p1 = scmp.ne.s32.totalorder %s4610_s23, %s4606_s22 }
  0x11   : > { %p57_p2 = scmp.eq.s32.totalorder %s4622_s26, 0  ;;  %p62_p3 = scmp.ne.s32.totalorder %s4606_s22, %s4602_s21 }
  0x12   : > { %s5277_s29 = smov (%p42_p0, %s40_s29), 0  ;;  %p63_p5 = scmp.eq.s32.totalorder %s4702_s27, 0 }
  0x13   : > { %5247 = sst [smem:[#allocation19_spill]] %s5277_s29  ;;  %p4714_p4 = por %p57_p2, %p56_p1 }
  0x14   : > { %s44_s8 = ssub.s32 %s4618_s25, %s5277_s29  ;;  %p214_p6 = scmp.eq.s32.totalorder %s4702_s27, 1 }
  0x15   : > { %p47_p7 = scmp.eq.s32.totalorder %s44_s8, 0  ;;  %p4722_p8 = por %p63_p5, %p62_p3 }
  0x16   : > { %p4726_p9 = por %p214_p6, %p56_p1  ;;  %p220_p10 = scmp.eq.s32.totalorder %s3919_s28, 1 }
  0x17   : > { %s5249_s9 = scalar_select %p4722_p8, 1, 0 }
  0x18   : > { %s5250_s10 = scalar_select %p4726_p9, 1, 0 }
  0x19   : > { %s4731_s11 = scalar_select %p47_p7, %s4610_s23, %s49_s30  }
  0x1a   : > { %p4733_p11 = por %p220_p10, %p62_p3  ;;  %p4336_p13 = scmp.lt.s32.totalorder %s4622_s26, 2 }
  0x1b   : > { %5251 = sst [smem:[#allocation20_spill]] %s4731_s11  ;;  %s4740_s13 = sand.u32 1, %s4610_s23  }
  0x1c   : > { %s5252_s12 = scalar_select %p4733_p11, 1, 0 }
  0x1d   : > { %s4743_s14 = sshll.u32 %s4740_s13, 3  ;;  %s4746_s15 = sshll.u32 %s4618_s25, 7 }
  0x1e   : > { %5253 = sst [smem:[#allocation21_spill]] %s5252_s12  ;;  %p4750_p0 = pnand %p4336_p13, %p4714_p4 }
  0x1f   : > { %s265_s17 = sand.u32 1, %s4622_s26   ;;  %s5255_s1 = sld [smem:[#allocation22_spill]] }
  0x20   : > { %s5254_s16 = scalar_select %p4750_p0, 1, 0 }
  0x21   : > { %s269_s28 = scalar_lea.vmem [#allocation5], %s4743_s14  ;;  %s4766_s7 = scalar_lea.sflag [#allocation6], %s265_s17 }
  0x22   : > { %s277_s30 = sshll.u32 %s269_s28, 4  ;;  %p4772_p4 = pneg %p4750_p0  ;;  %s4763_s30 = int_to_ptr.vmem [resolvable:$true] %s277_s30 }
  0x25   : > { %s4759_s20 = scalar_lea.hbm %s5255_s1, %s4746_s15  ;;  %s4417_s28 = scalar_lea.hbm %s5255_s1, 256 }
  0x26   : > { %s4412_s8 = scalar_lea.hbm %s4759_s20, 128  ;;  %p4418_p7 = scmp.lt.u32.totalorder %s4759_s20, %s5255_s1 }
  0x27   : > { %p4413_p3 = scmp.ne.s32.totalorder %s4759_s20, %s4412_s8  ;;  %p4419_p10 = scmp.lt.u32.totalorder %s4417_s28, %s4412_s8 }
  0x28   : > { %p4421_p12 = scmp.lt.u32.totalorder %s4412_s8, %s4759_s20 }
  0x29   : > { %p4415_p5 = pnand %p4772_p4, %p4413_p3  ;;  %p4420_p13 = por %p4419_p10, %p4418_p7 }
  0x2b   : > { %p4416_p6 = pneg %p4415_p5  ;;  %p4422_p1 = por %p4421_p12, %p4420_p13 }
  0x2d   : > { %p4423_p2 = pnand %p4422_p1, %p4416_p6 }
  0x2f   : > { %4426 = shalt.err (!%p4423_p2)
}
  0x30   : > { %s4427_s17 = scalar_lea.vmem %s4763_s30, 128  ;;  %s4624_s18 = smov [#allocation5]  }
  0x31   : > { %p4428_p3 = scmp.ne.s32.totalorder %s4763_s30, %s4427_s17  ;;  %s4432_s19 = sshll.u32 %s4624_s18, 4  ;;  %s4433_s19 = int_to_ptr.vmem [resolvable:$false] %s4432_s19 }
  0x32   : > { %s4434_s25 = scalar_lea.vmem %s4433_s19, 256  ;;  %p4435_p9 = scmp.lt.s32.totalorder %s4763_s30, %s4433_s19 }
  0x33   : > { %p4430_p5 = pnand %p4428_p3, %p4772_p4  ;;  %p4436_p8 = scmp.lt.s32.totalorder %s4434_s25, %s4427_s17 }
  0x35   : > { %p4431_p11 = pneg %p4430_p5  ;;  %p4437_p7 = por %p4436_p8, %p4435_p9 }
  0x37   : > { %p4438_p10 = pnand %p4437_p7, %p4431_p11 }
  0x39   : > { %4441 = shalt.err (!%p4438_p10)
}
  0x3a   : > { %4325 = dma.hbm_to_vmem [thread:$0]  (!%p4750_p0), %s4759_s20, 128, %s4763_s30, %s4766_s7  }
  0x3b   : > { %p5257_p12 = scmp.lt.s32.totalorder %s4622_s26, 3  ;;  %p5258_p1 = scmp.ge.s32.totalorder %s4622_s26, 1 }
  0x3c   : > { %s4808_s17 = scalar_lea.hbm %s5224_s0, %s4746_s15  ;;  %s250_s18 = scalar_lea.vmem [#allocation2], %s4743_s14 }
  0x3d   : > { %p4800_p2 = pnand %p5258_p1, %p5257_p12  ;;  %s258_s19 = sshll.u32 %s250_s18, 4  ;;  %s4811_s19 = int_to_ptr.vmem [resolvable:$true] %s258_s19 }
  0x3e   : > { %s4817_s25 = scalar_lea.hbm %s5226_s2, %s4746_s15  ;;  %s247_s1 = scalar_lea.sflag [#allocation3], %s4740_s13 }
  0x3f   : > { %s5259_s11 = scalar_select %p4800_p2, 1, 0 }
  0x40   : > { %s4442_s23 = scalar_lea.hbm %s4808_s17, 128  ;;  %s4447_s26 = scalar_lea.hbm %s5224_s0, 256 }
  0x41   : > { %p4443_p8 = scmp.ne.s32.totalorder %s4808_s17, %s4442_s23  ;;  %p4448_p6 = scmp.lt.u32.totalorder %s4808_s17, %s5224_s0 }
  0x42   : > { %p4449_p13 = scmp.lt.u32.totalorder %s4447_s26, %s4442_s23  ;;  %p4451_p5 = scmp.lt.u32.totalorder %s4442_s23, %s4808_s17 }
  0x43   : > { %p4445_p9 = pnand %p4443_p8, %p4772_p4 }
  0x44   : > { %p4450_p3 = por %p4449_p13, %p4448_p6 }
  0x45   : > { %p4446_p11 = pneg %p4445_p9 }
  0x46   : > { %p4452_p7 = por %p4451_p5, %p4450_p3 }
  0x48   : > { %p4453_p10 = pnand %p4452_p7, %p4446_p11 }
  0x4a   : > { %4456 = shalt.err (!%p4453_p10)
}
  0x4b   : > { %s4457_s18 = scalar_lea.vmem %s4811_s19, 128  ;;  %s4625_s20 = smov [#allocation2]  }
  0x4c   : > { %p4458_p12 = scmp.ne.s32.totalorder %s4811_s19, %s4457_s18  ;;  %s4462_s30 = sshll.u32 %s4625_s20, 4  ;;  %s4463_s30 = int_to_ptr.vmem [resolvable:$false] %s4462_s30 }
  0x4d   : > { %s4464_s21 = scalar_lea.vmem %s4463_s30, 256  ;;  %p4465_p9 = scmp.lt.s32.totalorder %s4811_s19, %s4463_s30 }
  0x4e   : > { %p4460_p1 = pnand %p4458_p12, %p4772_p4  ;;  %p4466_p2 = scmp.lt.s32.totalorder %s4464_s21, %s4457_s18 }
  0x50   : > { %p4461_p8 = pneg %p4460_p1  ;;  %p4467_p6 = por %p4466_p2, %p4465_p9 }
  0x52   : > { %p4468_p13 = pnand %p4467_p6, %p4461_p8 }
  0x54   : > { %4471 = shalt.err (!%p4468_p13)
}
  0x55   : > { %4322 = dma.hbm_to_vmem [thread:$0]  (!%p4750_p0), %s4808_s17, 128, %s4811_s19, %s247_s1  }
  0x56   : > { %s288_s23 = scalar_lea.vmem [#allocation7], %s4743_s14  ;;  %s4472_s12 = scalar_lea.hbm %s4817_s25, 128 }
  0x57   : > { %s296_s26 = sshll.u32 %s288_s23, 4  ;;  %p4473_p11 = scmp.ne.s32.totalorder %s4817_s25, %s4472_s12  ;;  %s297_s26 = int_to_ptr.vmem [resolvable:$true] %s296_s26 }
  0x58   : > { %s4477_s18 = scalar_lea.hbm %s5226_s2, 256  ;;  %p4478_p5 = scmp.lt.u32.totalorder %s4817_s25, %s5226_s2 }
  0x59   : > { %p4475_p2 = pnand %p4473_p11, %p4772_p4  ;;  %p4479_p7 = scmp.lt.u32.totalorder %s4477_s18, %s4472_s12 }
  0x5a   : > { %p4481_p12 = scmp.lt.u32.totalorder %s4472_s12, %s4817_s25 }
  0x5b   : > { %p4476_p3 = pneg %p4475_p2  ;;  %p4480_p10 = por %p4479_p7, %p4478_p5 }
  0x5d   : > { %p4482_p1 = por %p4481_p12, %p4480_p10 }
  0x5f   : > { %p4483_p8 = pnand %p4482_p1, %p4476_p3 }
  0x61   : > { %4486 = shalt.err (!%p4483_p8)
}
  0x62   : > { %s4487_s1 = scalar_lea.vmem %s297_s26, 128  ;;  %s4626_s17 = smov [#allocation7]  }
  0x63   : > { %p4488_p9 = scmp.ne.s32.totalorder %s297_s26, %s4487_s1  ;;  %s4492_s19 = sshll.u32 %s4626_s17, 4  ;;  %s4493_s19 = int_to_ptr.vmem [resolvable:$false] %s4492_s19 }
  0x64   : > { %s4494_s21 = scalar_lea.vmem %s4493_s19, 256  ;;  %p4495_p11 = scmp.lt.s32.totalorder %s297_s26, %s4493_s19 }
  0x65   : > { %p4490_p6 = pnand %p4488_p9, %p4772_p4  ;;  %p4496_p2 = scmp.lt.s32.totalorder %s4494_s21, %s4487_s1 }
  0x67   : > { %p4491_p13 = pneg %p4490_p6  ;;  %p4497_p0 = por %p4496_p2, %p4495_p11 }
  0x69   : > { %p4498_p5 = pnand %p4497_p0, %p4491_p13 }
  0x6b   : > { %4501 = shalt.err (!%p4498_p5)
}
  0x6c   : > { %p5260_p7 = scmp.ne.s32.totalorder %s5254_s16, 0  ;;  %s4864_s8 = scalar_lea.hbm %s5227_s3, %s4746_s15 }
  0x6d   : > { %s307_s28 = scalar_lea.vmem [#allocation8], %s4743_s14  ;;  %s304_s20 = scalar_lea.sflag [#allocation9], %s4740_s13 }
  0x6e   : > { %4328 = dma.hbm_to_vmem [thread:$0]  (!%p5260_p7), %s4817_s25, 128, %s297_s26, %s4766_s7  }
  0x6f   : > { %s315_s18 = sshll.u32 %s307_s28, 4  ;;  %s4502_s30 = scalar_lea.hbm %s4864_s8, 128  ;;  %s316_s18 = int_to_ptr.vmem [resolvable:$true] %s315_s18 }
  0x70   : > { %p4503_p0 = scmp.ne.s32.totalorder %s4864_s8, %s4502_s30  ;;  %s4507_s25 = scalar_lea.hbm %s5227_s3, 256 }
  0x71   : > { %p4508_p12 = scmp.lt.u32.totalorder %s4864_s8, %s5227_s3  ;;  %p4509_p1 = scmp.lt.u32.totalorder %s4507_s25, %s4502_s30 }
  0x72   : > { %p4505_p3 = pnand %p4503_p0, %p4772_p4  ;;  %p4511_p9 = scmp.lt.u32.totalorder %s4502_s30, %s4864_s8 }
  0x73   : > { %p4510_p8 = por %p4509_p1, %p4508_p12 }
  0x74   : > { %p4506_p10 = pneg %p4505_p3 }
  0x75   : > { %p4512_p6 = por %p4511_p9, %p4510_p8 }
  0x77   : > { %p4513_p13 = pnand %p4512_p6, %p4506_p10 }
  0x79   : > { %4516 = shalt.err (!%p4513_p13)
}
  0x7a   : > { %s4517_s13 = scalar_lea.vmem %s316_s18, 128  ;;  %s4627_s14 = smov [#allocation8]  }
  0x7b   : > { %p4518_p11 = scmp.ne.s32.totalorder %s316_s18, %s4517_s13  ;;  %s4522_s17 = sshll.u32 %s4627_s14, 4  ;;  %s4523_s17 = int_to_ptr.vmem [resolvable:$false] %s4522_s17 }
  0x7c   : > { %s4524_s19 = scalar_lea.vmem %s4523_s17, 256  ;;  %p4525_p0 = scmp.lt.s32.totalorder %s316_s18, %s4523_s17 }
  0x7d   : > { %p4520_p2 = pnand %p4518_p11, %p4772_p4  ;;  %p4526_p3 = scmp.lt.s32.totalorder %s4524_s19, %s4517_s13 }
  0x7f   : > { %p4521_p5 = pneg %p4520_p2  ;;  %p4527_p7 = por %p4526_p3, %p4525_p0 }
  0x81   : > { %p4528_p1 = pnand %p4527_p7, %p4521_p5 }
  0x83   : > { %4531 = shalt.err (!%p4528_p1)
}
  0x84   : > { %p5261_p12 = scmp.ne.s32.totalorder %s5254_s16, 0  ;;  %p5262_p10 = scmp.ne.s32.totalorder %s5259_s11, 0 }
  0x85   : > { %s4888_s29 = sand.u32 (!%p5262_p10), 1, %s4606_s22   ;;  %p5263_p4 = scmp.ne.s32.totalorder (!%p5262_p10), %s5249_s9, 0 }
  0x86   : > { %4331 = dma.hbm_to_vmem [thread:$0]  (!%p5261_p12), %s4864_s8, 128, %s316_s18, %s304_s20  }
  0x87   : > { %324 = sbr.rel (%p5262_p10) target bundleno = 1729 (0x6c1), region = 44  ;;  %s4891_s21 = sshll.u32 (!%p5262_p10), %s4888_s29, 3 }
  0x88   : > { %s327_s23 = scalar_lea.sflag (!%p5262_p10), [#allocation3], %s4888_s29  ;;  %s330_s12 = scalar_lea.vmem (!%p5262_p10), [#allocation2], %s4891_s21 }
  0x8e   : > { %4585 = dma.done.wait (%p5263_p4), %s327_s23, 128  }
  0x8f   : > { %4587 = vsyncadd (%p5263_p4), %s327_s23, 4294967168  ;;  %s335_s16 = sand.u32 1, %s4702_s27   ;;  %s339_s8 = scalar_lea.vmem [#allocation5], %s4891_s21 }
  0x90   : > { %s336_s11 = scalar_lea.sflag [#allocation6], %s335_s16 }
  0x91   : > { %4589 = dma.done.wait (%p5263_p4), %s336_s11, 256  }
  0x92   : > { %4591 = vsyncadd (%p5263_p4), %s336_s11, 4294967040  ;;  %s348_s28 = scalar_lea.vmem [#allocation7], %s4891_s21  ;;  %s354_s18 = scalar_lea.sflag [#allocation9], %s4888_s29 }
  0x93   : > { %s357_s20 = scalar_lea.vmem [#allocation8], %s4891_s21 }
  0x94   : > { %4593 = dma.done.wait (%p5263_p4), %s354_s18, 128  }
  0x95   : > { %4595 = vsyncadd (%p5263_p4), %s354_s18, 4294967168  ;;  %v4628_v0 = vmov 0.0   ;;  %vm4629_vm0 = vmmov 0   ;;  %vm411_vm1 = vcmask 64512   ;;  %v402_v1 = vld [vmem:[%s339_s8] sm:$0xff]  ;;  %v4921_v2 = vld [vmem:[%s5228_s4] sm:$0xff] }
  0x96   : > { %4041 = vmatprep.subr.mxu0 %v4628_v0  ;;  %4043 = vmatprep.mubr.msk.f32.mxu0 %vm4629_vm0, %v4628_v0  ;;  %v4923_v3 = vand.u32 4294901760, %v402_v1  ;;  %v413_v4 = vsel %vm411_vm1, %v4921_v2, 0  ;;  %v4930_v6 = vld [vmem:[%s5228_s4 + $0x10] sm:$0xff]  ;;  %v4944_v12 = vld [vmem:[%s5228_s4 + $0x8] sm:$0xff]  ;;  %s4630_s26 = smov 112   ;;  %vm1761_vm2 = vcmask 130048  }
  0x97   : > { %4026 = vmatprep.subr.mxu1 %v4628_v0  ;;  %4028 = vmatprep.mubr.msk.f32.mxu1 %vm4629_vm0, %v4628_v0  ;;  %v481_v5 = vand.u32 4294901760, %v413_v4  ;;  %v1311_v10 = vsel %vm411_vm1, %v4930_v6, 0  ;;  %v862_v17 = vsel %vm411_vm1, %v4944_v12, 0  ;;  %v401_v31 = vld [vmem:[%s330_s12] sm:$0xff]  ;;  %vm1778_vm3 = vcmask 7168   ;;  %s4634_s14 = smov 16  }
  0x98   : > { %4042 = vmatpush3.msra.mxu0 %v4923_v3  ;;  %4027 = vmatpush3.msra.mxu1 %v4923_v3  ;;  %v493_v7 = vsub.f32 %v402_v1, %v4923_v3  ;;  %v4947_v15 = vand.u32 4294901760, %v1311_v10  ;;  %v4956_v20 = vand.u32 4294901760, %v862_v17  ;;  %vm1780_vm4 = vcmask 15360   ;;  %v405_v60 = vld [vmem:[%s5229_s5] sm:$0xff]  ;;  %s3939_s17 = sshll.u32 %s4614_s24, 7  ;;  %s400_s19 = scalar_lea.vmem [#allocation10], %s4891_s21 }
  0x99   : > { %v482_v8 = vsub.f32 %v413_v4, %v481_v5  ;;  %4031 = vmatprep.subr.mxu1 %v4628_v0  ;;  %4046 = vmatprep.subr.mxu0 %v4628_v0  ;;  %vm1783_vm5 = vcmask 23552   ;;  %s3769_s23 = sshll.u32 %s400_s19, 4  ;;  %vm3752_vm6 = vcmask 261120   ;;  %s5174_s11 = scalar_lea.hbm %s5230_s6, %s3939_s17  ;;  %s5176_s23 = int_to_ptr.vmem [resolvable:$true] %s3769_s23 }
  0x9a   : > { %v4937_v9 = vand.u32 4294901760, %v493_v7  ;;  %v1380_v19 = vsub.f32 %v1311_v10, %v4947_v15  ;;  %v931_v22 = vsub.f32 %v862_v17, %v4956_v20  ;;  %s3755_s8 = scalar_lea.sflag [#allocation4], %s4888_s29  ;;  %p5264_p8 = scmp.ne.s32.totalorder %s5250_s10, 0 }
  0x9b   : > { %v483_v11 = vand.u32 4294901760, %v482_v8  ;;  %s4635_s24 = smov [#allocation10]  }
  0x9c   : > { %v495_v13 = vsub.f32 %v493_v7, %v4937_v9  ;;  %v1381_v21 = vand.u32 4294901760, %v1380_v19  ;;  %v932_v24 = vand.u32 4294901760, %v931_v22  ;;  %s4536_s21 = sshll.u32 %s4635_s24, 4  ;;  %s4537_s21 = int_to_ptr.vmem [resolvable:$false] %s4536_s21 }
  0x9d   : > { %4044 = vmatmul.mubr.f32.vlgmr.msra.gmra.mrb[0].mxu0 %v483_v11  ;;  %v484_v14 = vsub.f32 %v482_v8, %v483_v11  ;;  %s4538_s18 = scalar_lea.vmem %s4537_s21, 256  ;;  %p4539_p13 = scmp.lt.s32.totalorder %s5176_s23, %s4537_s21 }
  0x9e   : > { %v496_v16 = vand.u32 4294901760, %v495_v13  ;;  %4047 = vmatpush3.msra.mxu0 %v4937_v9  ;;  %4048 = vmatprep.mubr.msk.f32.mxu0 %vm4629_vm0, %v4628_v0  ;;  %v1382_v23 = vsub.f32 %v1380_v19, %v1381_v21  ;;  %v933_v26 = vsub.f32 %v931_v22, %v932_v24 }
  0x9f   : > { %v485_v18 = vand.u32 4294901760, %v484_v14  ;;  %4051 = vmatprep.subr.mxu0 %v4628_v0 }
  0xa0   : > { %v1383_v25 = vand.u32 4294901760, %v1382_v23  ;;  %v934_v27 = vand.u32 4294901760, %v933_v26  ;;  %v4631_v26 = vmov 1  }
  0xa1   : > { %4029 = vmatmul.mubr.f32.vlgmr.msra.gmra.mrb[0].mxu1 %v485_v18  ;;  %4394 = vset.pattern.permute.xlu1 %v4631_v26 }
  0xa2   : > { %4032 = vmatpush3.msra.mxu1 %v496_v16  ;;  %4033 = vmatprep.mubr.msk.f32.mxu1 %vm4629_vm0, %v4628_v0 }
  0xa3   : > { %4036 = vmatprep.subr.mxu1 %v4628_v0 }
  0xa5   : > { %4049 = vmatmul.mubr.f32.vlgmr.msra.gmra.mrb[0].mxu0 %v481_v5 }
  0xa6   : > { %4052 = vmatpush3.msra.mxu0 %v4923_v3  ;;  %4053 = vmatprep.mubr.msk.f32.mxu0 %vm4629_vm0, %v4628_v0 }
  0xa7   : > { %4086 = vmatprep.subr.mxu0 %v4628_v0 }
  0xa9   : > { %4034 = vmatmul.mubr.f32.vlgmr.msra.gmra.mrb[0].mxu1 %v481_v5 }
  0xaa   : > { %4037 = vmatpush3.msra.mxu1 %v493_v7  ;;  %4038 = vmatprep.mubr.msk.f32.mxu1 %vm4629_vm0, %v4628_v0 }
  0xab   : > { %4056 = vmatprep.subr.mxu1 %v4628_v0 }
  0xad   : > { %4054 = vmatmul.mubr.f32.vlgmr.msra.gmra.mrb[0].mxu0 %v481_v5 }
  0xae   : > { %4087 = vmatpush3.msra.mxu0 %v4923_v3  ;;  %4088 = vmatprep.mubr.msk.f32.mxu0 %vm4629_vm0, %v4628_v0 }
  0xaf   : > { %4091 = vmatprep.subr.mxu0 %v4628_v0 }
  0xb1   : > { %4039 = vmatmul.mubr.f32.vlgmr.msra.gmra.mrb[0].mxu1 %v482_v8  ;;  %4089 = vmatmul.mubr.f32.vlgmr.msra.gmra.mrb[2].mxu0 %v1383_v25 }
  0xb2   : > { %4057 = vmatpush3.msra.mxu1 %v4923_v3  ;;  %4058 = vmatprep.mubr.msk.f32.mxu1 %vm4629_vm0, %v4628_v0 }
  0xb3   : > { %4061 = vmatprep.subr.mxu1 %v4628_v0  ;;  %4092 = vmatpush3.msra.mxu0 %v496_v16 }
  0xb4   : > { %4093 = vmatprep.mubr.msk.f32.mxu0 %vm4629_vm0, %v4628_v0  ;;  %4096 = vmatprep.subr.mxu0 %v4628_v0 }
  0xb5   : > { %4059 = vmatmul.mubr.f32.vlgmr.msra.gmra.mrb[2].mxu1 %v934_v27  ;;  %v4632_v27 = vmov 0  }
  0xb6   : > { %4062 = vmatpush3.msra.mxu1 %v496_v16  ;;  %4063 = vmatprep.mubr.msk.f32.mxu1 %vm4629_vm0, %v4628_v0 }
  0xb7   : > { %4066 = vmatprep.subr.mxu1 %v4628_v0  ;;  %4393 = vset.pattern.permute.xlu0 %v4632_v27 }
  0xb9   : > { %4094 = vmatmul.mubr.f32.vlgmr.msra.gmra.mrb[2].mxu0 %v4947_v15 }
  0xba   : > { %4097 = vmatpush3.msra.mxu0 %v493_v7  ;;  %4098 = vmatprep.mubr.msk.f32.mxu0 %vm4629_vm0, %v4628_v0 }
  0xbb   : > { %4101 = vmatprep.subr.mxu0 %v4628_v0 }
  0xbd   : > { %4064 = vmatmul.mubr.f32.vlgmr.msra.gmra.mrb[2].mxu1 %v4956_v20 }
  0xbe   : > { %4067 = vmatpush3.msra.mxu1 %v493_v7  ;;  %4068 = vmatprep.mubr.msk.f32.mxu1 %vm4629_vm0, %v4628_v0 }
  0xbf   : > { %4071 = vmatprep.subr.mxu1 %v4628_v0 }
  0xc1   : > { %4099 = vmatmul.mubr.f32.vlgmr.msra.gmra.mrb[2].mxu0 %v1380_v19 }
  0xc2   : > { %4102 = vmatpush3.msra.mxu0 %v4923_v3  ;;  %4103 = vmatprep.mubr.msk.f32.mxu0 %vm4629_vm0, %v4628_v0 }
  0xc3   : > { %4106 = vmatprep.subr.mxu0 %v4628_v0 }
  0xc5   : > { %4069 = vmatmul.mubr.f32.vlgmr.msra.gmra.mrb[2].mxu1 %v931_v22 }
  0xc6   : > { %4072 = vmatpush3.msra.mxu1 %v4923_v3  ;;  %4073 = vmatprep.mubr.msk.f32.mxu1 %vm4629_vm0, %v4628_v0 }
  0xc7   : > { %4076 = vmatprep.subr.mxu1 %v4628_v0 }
  0xc9   : > { %4104 = vmatmul.mubr.f32.vlgmr.msra.gmra.mrb[2].mxu0 %v1381_v21 }
  0xca   : > { %4107 = vmatpush3.msra.mxu0 %v4937_v9  ;;  %4108 = vmatprep.mubr.msk.f32.mxu0 %vm4629_vm0, %v4628_v0 }
  0xcb   : > { %4111 = vmatprep.subr.mxu0 %v4628_v0 }
  0xcd   : > { %4074 = vmatmul.mubr.f32.vlgmr.msra.gmra.mrb[2].mxu1 %v932_v24 }
  0xce   : > { %4077 = vmatpush3.msra.mxu1 %v4937_v9  ;;  %4078 = vmatprep.mubr.msk.f32.mxu1 %vm4629_vm0, %v4628_v0 }
  0xcf   : > { %4081 = vmatprep.subr.mxu1 %v4628_v0 }
  0xd1   : > { %4109 = vmatmul.mubr.f32.vlgmr.msra.gmra.mrb[2].mxu0 %v4947_v15 }
  0xd2   : > { %4112 = vmatpush3.msra.mxu0 %v4923_v3  ;;  %4113 = vmatprep.mubr.msk.f32.mxu0 %vm4629_vm0, %v4628_v0 }
  0xd3   : > { %4176 = vmatprep.subr.mxu0 %v4628_v0 }
  0xd5   : > { %4079 = vmatmul.mubr.f32.vlgmr.msra.gmra.mrb[2].mxu1 %v4956_v20 }
  0xd6   : > { %4082 = vmatpush3.msra.mxu1 %v4923_v3  ;;  %4083 = vmatprep.mubr.msk.f32.mxu1 %vm4629_vm0, %v4628_v0 }
  0xd7   : > { %4116 = vmatprep.subr.mxu1 %v4628_v0 }
  0xd9   : > { %4114 = vmatmul.mubr.f32.vlgmr.msra.gmra.mrb[2].mxu0 %v4947_v15 }
  0xda   : > { %4178 = vmatprep.mubr.msk.f32.mxu0 %vm4629_vm0, %v4628_v0 }
  0xdd   : > { %4084 = vmatmul.mubr.f32.vlgmr.msra.gmra.mrb[2].mxu1 %v4956_v20 }
  0xde   : > { %4118 = vmatprep.mubr.msk.f32.mxu1 %vm4629_vm0, %v4628_v0 }
 0x180   : > { %v857_v28 = vpop.f32.mrb[0].mxu0 }
 0x181   : > { %v4055_v29 = vpop.f32.mrb[1].mxu0 }
 0x184   : > { %v637_v30 = vpop.f32.mrb[0].mxu1 }
 0x185   : > { %v4236_v32 = vadd.f32 %v857_v28, %v637_v30  ;;  %v4040_v33 = vpop.f32.mrb[1].mxu1  ;;  %v5045_v28 = vld [vmem:[%s357_s20] sm:$0xff] }
 0x186   : > { %v5048_v29 = vand.u32 4294901760, %v5045_v28 }
 0x187   : > { %v1759_v34 = vsub.f32 %v401_v31, %v4236_v32 }
 0x188   : > { %4117 = vmatpush3.msra.mxu1 %v5048_v29 }
 0x189   : > { %v1760_v35 = vand.u32 2147483647, %v1759_v34  ;;  %4121 = vmatprep.subr.mxu1 %v4628_v0 }
 0x18b   : > { %2749 = vrot.lane.b32.xlu0 %v1760_v35, %s4630_s26  ;;  %v1762_v46 = vsel %vm1761_vm2, %v1760_v35, 0.0 }
 0x1ac   : > { %v1755_v36 = vpop.f32.mrb[2].mxu0 }
 0x1ad   : > { %v1772_v37 = vsub.f32 %v401_v31, %v1755_v36  ;;  %v4115_v38 = vpop.f32.mrb[3].mxu0 }
 0x1af   : > { %v1773_v39 = vand.u32 2147483647, %v1772_v37 }
 0x1b0   : > { %v1306_v40 = vpop.f32.mrb[2].mxu1 }
 0x1b1   : > { %v1766_v41 = vsub.f32 %v401_v31, %v1306_v40  ;;  %v4085_v42 = vpop.f32.mrb[3].mxu1  ;;  %2765 = vrot.lane.b32.xlu1 %v1773_v39, %s4630_s26  ;;  %v1774_v47 = vsel %vm1761_vm2, %v1773_v39, 0.0 }
 0x1b2   : > { %v5054_v42 = vld [vmem:[%s348_s28] sm:$0xff]  ;;  %s4532_s28 = scalar_lea.vmem %s5176_s23, 128 }
 0x1b3   : > { %v1767_v43 = vand.u32 2147483647, %v1766_v41  ;;  %p4533_p7 = scmp.ne.s32.totalorder %s5176_s23, %s4532_s28  ;;  %p4540_p11 = scmp.lt.s32.totalorder %s4538_s18, %s4532_s28 }
 0x1b5   : > { %2757 = vrot.lane.b32.xlu0 %v1767_v43, %s4630_s26  ;;  %v1768_v52 = vsel %vm1761_vm2, %v1767_v43, 0.0  ;;  %v4633_v43 = vmov 2   ;;  %p4534_p9 = pnand %p4533_p7, %p5264_p8  ;;  %p4541_p2 = por %p4540_p11, %p4539_p13 }
 0x1b7   : > { %p4535_p6 = pneg %p4534_p9 }
 0x1b9   : > { %p4542_p5 = pnand %p4541_p2, %p4535_p6 }
 0x1fd   : > { %v2750_v44 = vpop.permute.xlu0 %2749 }
 0x1fe   : > { %v2752_v45 = vsel %vm1761_vm2, %v2750_v44, 0.0 }
 0x1ff   : > { %2753 = vadd.xlane.f32.xlu1 %v2752_v45 }
 0x203   : > { %1763 = vadd.xlane.f32.xlu1 %v1762_v46 }
 0x207   : > { %1775 = vadd.xlane.f32.xlu1 %v1774_v47 }
 0x223   : > { %v2766_v50 = vpop.permute.xlu1 %2765 }
 0x224   : > { %v2768_v51 = vsel %vm1761_vm2, %v2766_v50, 0.0 }
 0x227   : > { %v2758_v48 = vpop.permute.xlu0 %2757 }
 0x228   : > { %v2760_v49 = vsel %vm1761_vm2, %v2758_v48, 0.0 }
 0x229   : > { %2761 = vadd.xlane.f32.xlu0 %v2760_v49 }
 0x22d   : > { %2769 = vadd.xlane.f32.xlu0 %v2768_v51 }
 0x231   : > { %1769 = vadd.xlane.f32.xlu0 %v1768_v52 }
 0x28c   : > { %v2754_v53 = vpop.xlane.xlu1 %2753 }
 0x28d   : > { %v2755_v57 = vmul.f32 -0.25, %v2754_v53 }
 0x290   : > { %v1764_v55 = vpop.xlane.xlu1 %1763 }
 0x291   : > { %v1765_v4 = vmul.f32 -0.25, %v1764_v55 }
 0x294   : > { %v1776_v62 = vpop.xlane.xlu1 %1775 }
 0x295   : > { %v1777_v7 = vmul.f32 -0.25, %v1776_v62 }
 0x2b6   : > { %v2762_v54 = vpop.xlane.xlu0 %2761 }
 0x2b7   : > { %v2763_v56 = vmul.f32 -0.25, %v2762_v54 }
 0x2b9   : > { %v2772_v61 = vsel %vm1778_vm3, %v2755_v57, %v2763_v56 }
 0x2ba   : > { %v2770_v58 = vpop.xlane.xlu0 %2769 }
 0x2bb   : > { %v2771_v59 = vmul.f32 -0.25, %v2770_v58 }
 0x2bd   : > { %v2773_v63 = vsel %vm1780_vm4, %v2772_v61, %v2771_v59 }
 0x2be   : > { %v1770_v1 = vpop.xlane.xlu0 %1769  ;;  %v2774_v3 = vadd.f32 %v2773_v63, %v405_v60 }
 0x2bf   : > { %v1771_v5 = vmul.f32 -0.25, %v1770_v1 }
 0x2c0   : > { %v2775_v8 = vsel %vm1783_vm5, %v2774_v3, -inf }
 0x2c1   : > { %v1779_v9 = vsel %vm1778_vm3, %v1765_v4, %v1771_v5  ;;  %2776 = vmax.xlane.f32.xlu0 %v2775_v8 }
 0x2c2   : > { %v1781_v10 = vsel %vm1780_vm4, %v1779_v9, %v1777_v7 }
 0x2c3   : > { %v1782_v11 = vadd.f32 %v1781_v10, %v405_v60 }
 0x2c5   : > { %v1784_v13 = vsel %vm1783_vm5, %v1782_v11, -inf }
 0x2c6   : > { %1785 = vmax.xlane.f32.xlu1 %v1784_v13  ;;  %v1931_v13 = vsub.f32 %v5045_v28, %v5048_v29 }
 0x34e   : > { %v2777_v14 = vpop.xlane.xlu0 %2776 }
 0x34f   : > { %v2778_v15 = vmax.f32 %v2777_v14, 0.0 }
 0x351   : > { %v2779_v16 = vsub.f32 %v2774_v3, %v2778_v15  ;;  %v2785_v30 = vsub.f32 0.0, %v2778_v15  ;;  %v1932_v15 = vand.u32 4294901760, %v1931_v13 }
 0x353   : > { %v2780_v17 = vmul.f32 1.442695, %v2779_v16  ;;  %v1786_v18 = vpop.xlane.xlu1 %1785  ;;  %v2786_v31 = vmul.f32 1.442695, %v2785_v30 }
 0x354   : > { %v1787_v19 = vmax.f32 %v1786_v18, 0.0 }
 0x355   : > { %4400 = vpow2.f32 %v2780_v17 }
 0x356   : > { %v1788_v20 = vsub.f32 %v1782_v11, %v1787_v19  ;;  %v1794_v32 = vsub.f32 0.0, %v1787_v19  ;;  %v1933_v19 = vsub.f32 %v1931_v13, %v1932_v15 }
 0x358   : > { %v1789_v21 = vmul.f32 1.442695, %v1788_v20  ;;  %v1795_v33 = vmul.f32 1.442695, %v1794_v32 }
 0x35a   : > { %4402 = vpow2.f32 %v1789_v21 }
 0x35b   : > { %4404 = vpow2.f32 %v2786_v31 }
 0x35c   : > { %4406 = vpow2.f32 %v1795_v33 }
 0x35f   : > { %v4401_v22 = vpop.eup %4400 }
 0x360   : > { %v2782_v23 = vsel %vm1783_vm5, %v4401_v22, 0.0 }
 0x361   : > { %2783 = vadd.xlane.f32.xlu0 %v2782_v23 }
 0x364   : > { %v4403_v24 = vpop.eup %4402 }
 0x365   : > { %v1791_v25 = vsel %vm1783_vm5, %v4403_v24, 0.0  ;;  %v4405_v34 = vpop.eup %4404 }
 0x366   : > { %1792 = vadd.xlane.f32.xlu1 %v1791_v25  ;;  %v4407_v38 = vpop.eup %4406 }
 0x3ee   : > { %v2784_v35 = vpop.xlane.xlu0 %2783 }
 0x3ef   : > { %v2788_v36 = vadd.f32 %v4405_v34, %v2784_v35 }
 0x3f1   : > { %4408 = vrcp.f32 %v2788_v36 }
 0x3f3   : > { %v1793_v37 = vpop.xlane.xlu1 %1792 }
 0x3f4   : > { %v1797_v39 = vadd.f32 %v4407_v38, %v1793_v37  ;;  %v2303_v37 = vand.u32 4294901760, %v5054_v42 }
 0x3f6   : > { %4410 = vrcp.f32 %v1797_v39  ;;  %v2380_v39 = vsub.f32 %v5054_v42, %v2303_v37 }
 0x3fb   : > { %v4409_v40 = vpop.eup %4408 }
 0x3fc   : > { %v2790_v41 = vmul.f32 %v4409_v40, %v4401_v22  ;;  %v1934_v22 = vand.u32 4294901760, %v1933_v19 }
 0x3fe   : > { %2793 = vperm.xlu0 %4393, %v2790_v41   ;;  %2798 = vperm.xlu1 %4394, %v2790_v41  }
 0x400   : > { %v4411_v44 = vpop.eup %4410 }
 0x401   : > { %v1799_v45 = vmul.f32 %v4411_v44, %v4403_v24 }
 0x402   : > { %4395 = vset.pattern.permute.xlu1 %v4633_v43  ;;  %3295 = vrot.lane.b32.xlu0 %v5054_v42, %s4630_s26 }
 0x403   : > { %2804 = vperm.xlu1 %4395, %v2790_v41   ;;  %v2381_v41 = vand.u32 4294901760, %v2380_v39 }
 0x407   : > { %2842 = vrot.lane.b32.xlu1 %v5045_v28, %s4630_s26 }
 0x408   : > { %4396 = vset.pattern.permute.xlu1 %v4632_v27 }
 0x40b   : > { %1802 = vperm.xlu1 %4396, %v1799_v45  }
 0x40f   : > { %4397 = vset.pattern.permute.xlu1 %v4631_v26 }
 0x410   : > { %1807 = vperm.xlu1 %4397, %v1799_v45  }
 0x414   : > { %4398 = vset.pattern.permute.xlu1 %v4633_v43 }
 0x415   : > { %1813 = vperm.xlu1 %4398, %v1799_v45  }
 0x47d   : > { %v2794_v46 = vpop.permute.xlu0 %2793  ;;  %v2799_v47 = vpop.permute.xlu1 %2798 }
 0x47e   : > { %v2796_v48 = vmul.f32 %v2794_v46, %v4921_v2  ;;  %v2801_v49 = vmul.f32 %v4944_v12, %v2799_v47 }
 0x480   : > { %v2802_v51 = vadd.f32 %v2801_v49, %v2796_v48 }
 0x482   : > { %v2805_v50 = vpop.permute.xlu1 %2804 }
 0x483   : > { %v2807_v52 = vmul.f32 %v4930_v6, %v2805_v50 }
 0x485   : > { %v2808_v53 = vadd.f32 %v2807_v52, %v2802_v51 }
 0x486   : > { %v2843_v54 = vpop.permute.xlu1 %2842 }
 0x487   : > { %v5063_v55 = vand.u32 4294901760, %v2843_v54  ;;  %2809 = vxpose.xlu1.b32.start.end [1/1] (short) (narrow) %v2808_v53, 8  ;;  %v3299_v24 = vsel %vm411_vm1, %v2808_v53, 0 }
 0x488   : > { %v5104_v26 = vand.u32 4294901760, %v3299_v24 }
 0x489   : > { %4177 = vmatpush3.msra.mxu0 %v5063_v55  ;;  %v2926_v1 = vsub.f32 %v2843_v54, %v5063_v55 }
 0x48a   : > { %v1803_v56 = vpop.permute.xlu1 %1802  ;;  %4181 = vmatprep.subr.mxu0 %v4628_v0  ;;  %v3368_v28 = vsub.f32 %v3299_v24, %v5104_v26 }
 0x48b   : > { %v1805_v59 = vmul.f32 %v1803_v56, %v4921_v2  ;;  %v2927_v7 = vand.u32 4294901760, %v2926_v1 }
 0x48c   : > { %v3369_v31 = vand.u32 4294901760, %v3368_v28 }
 0x48d   : > { %v2928_v9 = vsub.f32 %v2926_v1, %v2927_v7 }
 0x48e   : > { %v3370_v33 = vsub.f32 %v3368_v28, %v3369_v31 }
 0x48f   : > { %v1808_v57 = vpop.permute.xlu1 %1807  ;;  %v2929_v11 = vand.u32 4294901760, %v2928_v9 }
 0x490   : > { %v1810_v58 = vmul.f32 %v4944_v12, %v1808_v57  ;;  %v3371_v36 = vand.u32 4294901760, %v3370_v33 }
 0x492   : > { %v1811_v61 = vadd.f32 %v1810_v58, %v1805_v59 }
 0x494   : > { %v1814_v60 = vpop.permute.xlu1 %1813 }
 0x495   : > { %v1816_v62 = vmul.f32 %v4930_v6, %v1814_v60  ;;  %v3296_v6 = vpop.permute.xlu0 %3295 }
 0x496   : > { %v5102_v25 = vand.u32 4294901760, %v3296_v6 }
 0x497   : > { %v5070_v63 = vadd.f32 %v1816_v62, %v1811_v61 }
 0x498   : > { %v3379_v27 = vsub.f32 %v3296_v6, %v5102_v25 }
 0x499   : > { %1818 = vxpose.xlu0.b32.start.end [1/1] (short) (narrow) %v5070_v63, 8  ;;  %v2300_v34 = vsel %vm411_vm1, %v5070_v63, 0 }
 0x49a   : > { %v3380_v30 = vand.u32 4294901760, %v3379_v27  ;;  %v2368_v38 = vand.u32 4294901760, %v2300_v34 }
 0x49c   : > { %v3381_v32 = vsub.f32 %v3379_v27, %v3380_v30  ;;  %v2369_v40 = vsub.f32 %v2300_v34, %v2368_v38 }
 0x49e   : > { %v3382_v35 = vand.u32 4294901760, %v3381_v32 }
 0x4c2   : > { %4399 = vset.pattern.permute.xlu0 %v4633_v43  ;;  %v2370_v43 = vand.u32 4294901760, %v2369_v40 }
 0x4c4   : > { %v2371_v42 = vsub.f32 %v2369_v40, %v2370_v43 }
 0x4c6   : > { %v2372_v45 = vand.u32 4294901760, %v2371_v42 }
 0x507   : > { %v2825_v3 = vpop.trf.xlu1 }
 0x508   : > { %v2846_v4 = vsel %vm411_vm1, %v2825_v3, 0 }
 0x509   : > { %v2914_v5 = vand.u32 4294901760, %v2846_v4 }
 0x50b   : > { %v2915_v8 = vsub.f32 %v2846_v4, %v2914_v5 }
 0x50d   : > { %v2916_v12 = vand.u32 4294901760, %v2915_v8 }
 0x50f   : > { %v2917_v2 = vsub.f32 %v2915_v8, %v2916_v12 }
 0x511   : > { %v2918_v10 = vand.u32 4294901760, %v2917_v2 }
 0x513   : > { %4179 = vmatmul.mubr.f32.vlgmr.msra.gmra.mrb[4].mxu0 %v2918_v10 }
 0x514   : > { %4182 = vmatpush3.msra.mxu0 %v2929_v11  ;;  %4183 = vmatprep.mubr.msk.f32.mxu0 %vm4629_vm0, %v4628_v0 }
 0x515   : > { %4186 = vmatprep.subr.mxu0 %v4628_v0 }
 0x519   : > { %v1834_v14 = vpop.trf.xlu0 }
 0x51a   : > { %v1851_v16 = vsel %vm411_vm1, %v1834_v14, 0 }
 0x51b   : > { %v5081_v17 = vand.u32 4294901760, %v1851_v16  ;;  %4184 = vmatmul.mubr.f32.vlgmr.msra.gmra.mrb[4].mxu0 %v2914_v5 }
 0x51c   : > { %4187 = vmatpush3.msra.mxu0 %v2926_v1  ;;  %4188 = vmatprep.mubr.msk.f32.mxu0 %vm4629_vm0, %v4628_v0 }
 0x51d   : > { %v1920_v18 = vsub.f32 %v1851_v16, %v5081_v17  ;;  %4191 = vmatprep.subr.mxu0 %v4628_v0 }
 0x51f   : > { %v1921_v20 = vand.u32 4294901760, %v1920_v18 }
 0x521   : > { %v1922_v21 = vsub.f32 %v1920_v18, %v1921_v20 }
 0x523   : > { %v1923_v23 = vand.u32 4294901760, %v1922_v21  ;;  %4189 = vmatmul.mubr.f32.vlgmr.msra.gmra.mrb[4].mxu0 %v2915_v8 }
 0x524   : > { %4192 = vmatpush3.msra.mxu0 %v5063_v55  ;;  %4193 = vmatprep.mubr.msk.f32.mxu0 %vm4629_vm0, %v4628_v0 }
 0x525   : > { %4119 = vmatmul.mubr.f32.vlgmr.msra.gmra.mrb[4].mxu1 %v1923_v23  ;;  %4196 = vmatprep.subr.mxu0 %v4628_v0 }
 0x526   : > { %4122 = vmatpush3.msra.mxu1 %v1934_v22  ;;  %4123 = vmatprep.mubr.msk.f32.mxu1 %vm4629_vm0, %v4628_v0 }
 0x527   : > { %4126 = vmatprep.subr.mxu1 %v4628_v0 }
 0x52b   : > { %4194 = vmatmul.mubr.f32.vlgmr.msra.gmra.mrb[4].mxu0 %v2916_v12 }
 0x52c   : > { %4197 = vmatpush3.msra.mxu0 %v2927_v7  ;;  %4198 = vmatprep.mubr.msk.f32.mxu0 %vm4629_vm0, %v4628_v0 }
 0x52d   : > { %4124 = vmatmul.mubr.f32.vlgmr.msra.gmra.mrb[4].mxu1 %v5081_v17  ;;  %4201 = vmatprep.subr.mxu0 %v4628_v0 }
 0x52e   : > { %4127 = vmatpush3.msra.mxu1 %v1931_v13  ;;  %4128 = vmatprep.mubr.msk.f32.mxu1 %vm4629_vm0, %v4628_v0 }
 0x52f   : > { %4131 = vmatprep.subr.mxu1 %v4628_v0 }
 0x533   : > { %4199 = vmatmul.mubr.f32.vlgmr.msra.gmra.mrb[4].mxu0 %v2914_v5 }
 0x534   : > { %4202 = vmatpush3.msra.mxu0 %v5063_v55  ;;  %4203 = vmatprep.mubr.msk.f32.mxu0 %vm4629_vm0, %v4628_v0 }
 0x535   : > { %4129 = vmatmul.mubr.f32.vlgmr.msra.gmra.mrb[4].mxu1 %v1920_v18  ;;  %4206 = vmatprep.subr.mxu0 %v4628_v0 }
 0x536   : > { %4132 = vmatpush3.msra.mxu1 %v5048_v29  ;;  %4133 = vmatprep.mubr.msk.f32.mxu1 %vm4629_vm0, %v4628_v0 }
 0x537   : > { %4136 = vmatprep.subr.mxu1 %v4628_v0 }
 0x53b   : > { %4204 = vmatmul.mubr.f32.vlgmr.msra.gmra.mrb[4].mxu0 %v2914_v5 }
 0x53c   : > { %4207 = vmatpush3.msra.mxu0 %v5102_v25  ;;  %4208 = vmatprep.mubr.msk.f32.mxu0 %vm4629_vm0, %v4628_v0 }
 0x53d   : > { %4134 = vmatmul.mubr.f32.vlgmr.msra.gmra.mrb[4].mxu1 %v1921_v20  ;;  %4211 = vmatprep.subr.mxu0 %v4628_v0 }
 0x53e   : > { %4137 = vmatpush3.msra.mxu1 %v1932_v15  ;;  %4138 = vmatprep.mubr.msk.f32.mxu1 %vm4629_vm0, %v4628_v0 }
 0x53f   : > { %4141 = vmatprep.subr.mxu1 %v4628_v0 }
 0x543   : > { %4209 = vmatmul.mubr.f32.vlgmr.msra.gmra.mrb[4].mxu0 %v3371_v36 }
 0x544   : > { %4212 = vmatpush3.msra.mxu0 %v3382_v35  ;;  %4213 = vmatprep.mubr.msk.f32.mxu0 %vm4629_vm0, %v4628_v0 }
 0x545   : > { %4139 = vmatmul.mubr.f32.vlgmr.msra.gmra.mrb[4].mxu1 %v5081_v17  ;;  %4216 = vmatprep.subr.mxu0 %v4628_v0 }
 0x546   : > { %4142 = vmatpush3.msra.mxu1 %v5048_v29  ;;  %4143 = vmatprep.mubr.msk.f32.mxu1 %vm4629_vm0, %v4628_v0  ;;  %v2382_v29 = vsub.f32 %v2380_v39, %v2381_v41 }
 0x547   : > { %4146 = vmatprep.subr.mxu1 %v4628_v0 }
 0x548   : > { %v2383_v44 = vand.u32 4294901760, %v2382_v29 }
 0x54b   : > { %4214 = vmatmul.mubr.f32.vlgmr.msra.gmra.mrb[4].mxu0 %v5104_v26 }
 0x54c   : > { %4217 = vmatpush3.msra.mxu0 %v3379_v27  ;;  %4218 = vmatprep.mubr.msk.f32.mxu0 %vm4629_vm0, %v4628_v0 }
 0x54d   : > { %4144 = vmatmul.mubr.f32.vlgmr.msra.gmra.mrb[4].mxu1 %v5081_v17  ;;  %4221 = vmatprep.subr.mxu0 %v4628_v0 }
 0x54e   : > { %4147 = vmatpush3.msra.mxu1 %v2303_v37  ;;  %4148 = vmatprep.mubr.msk.f32.mxu1 %vm4629_vm0, %v4628_v0 }
 0x54f   : > { %4151 = vmatprep.subr.mxu1 %v4628_v0 }
 0x553   : > { %4219 = vmatmul.mubr.f32.vlgmr.msra.gmra.mrb[4].mxu0 %v3368_v28 }
 0x554   : > { %4222 = vmatpush3.msra.mxu0 %v5102_v25  ;;  %4223 = vmatprep.mubr.msk.f32.mxu0 %vm4629_vm0, %v4628_v0 }
 0x555   : > { %4149 = vmatmul.mubr.f32.vlgmr.msra.gmra.mrb[4].mxu1 %v2372_v45  ;;  %4226 = vmatprep.subr.mxu0 %v4628_v0 }
 0x556   : > { %4152 = vmatpush3.msra.mxu1 %v2383_v44  ;;  %4153 = vmatprep.mubr.msk.f32.mxu1 %vm4629_vm0, %v4628_v0 }
 0x557   : > { %4156 = vmatprep.subr.mxu1 %v4628_v0 }
 0x55b   : > { %4224 = vmatmul.mubr.f32.vlgmr.msra.gmra.mrb[4].mxu0 %v3369_v31 }
 0x55c   : > { %4227 = vmatpush3.msra.mxu0 %v3380_v30  ;;  %4228 = vmatprep.mubr.msk.f32.mxu0 %vm4629_vm0, %v4628_v0 }
 0x55d   : > { %4154 = vmatmul.mubr.f32.vlgmr.msra.gmra.mrb[4].mxu1 %v2368_v38  ;;  %4231 = vmatprep.subr.mxu0 %v4628_v0 }
 0x55e   : > { %4157 = vmatpush3.msra.mxu1 %v2380_v39  ;;  %4158 = vmatprep.mubr.msk.f32.mxu1 %vm4629_vm0, %v4628_v0 }
 0x55f   : > { %4161 = vmatprep.subr.mxu1 %v4628_v0 }
 0x563   : > { %4229 = vmatmul.mubr.f32.vlgmr.msra.gmra.mrb[4].mxu0 %v5104_v26 }
 0x564   : > { %4232 = vmatpush3.msra.mxu0 %v5102_v25  ;;  %4233 = vmatprep.mubr.msk.f32.mxu0 %vm4629_vm0, %v4628_v0 }
 0x565   : > { %4159 = vmatmul.mubr.f32.vlgmr.msra.gmra.mrb[4].mxu1 %v2369_v40 }
 0x566   : > { %4162 = vmatpush3.msra.mxu1 %v2303_v37  ;;  %4163 = vmatprep.mubr.msk.f32.mxu1 %vm4629_vm0, %v4628_v0 }
 0x567   : > { %4166 = vmatprep.subr.mxu1 %v4628_v0 }
 0x56b   : > { %4234 = vmatmul.mubr.f32.vlgmr.msra.gmra.mrb[4].mxu0 %v5104_v26 }
 0x56d   : > { %4164 = vmatmul.mubr.f32.vlgmr.msra.gmra.mrb[4].mxu1 %v2370_v43 }
 0x56e   : > { %4167 = vmatpush3.msra.mxu1 %v2381_v41  ;;  %4168 = vmatprep.mubr.msk.f32.mxu1 %vm4629_vm0, %v4628_v0 }
 0x56f   : > { %4171 = vmatprep.subr.mxu1 %v4628_v0 }
 0x575   : > { %4169 = vmatmul.mubr.f32.vlgmr.msra.gmra.mrb[4].mxu1 %v2368_v38 }
 0x576   : > { %4172 = vmatpush3.msra.mxu1 %v2303_v37  ;;  %4173 = vmatprep.mubr.msk.f32.mxu1 %vm4629_vm0, %v4628_v0 }
 0x57d   : > { %4174 = vmatmul.mubr.f32.vlgmr.msra.gmra.mrb[4].mxu1 %v2368_v38 }
 0x63e   : > { %v3743_v46 = vpop.f32.mrb[4].mxu0 }
 0x63f   : > { %3748 = vrot.lane.b32.xlu0 %v3743_v46, %s4634_s14  ;;  %v4235_v47 = vpop.f32.mrb[5].mxu0 }
 0x650   : > { %v2744_v48 = vpop.f32.mrb[4].mxu1 }
 0x651   : > { %v4175_v49 = vpop.f32.mrb[5].mxu1 }
 0x6b1   : > { %v3749_v50 = vpop.permute.xlu0 %3748 }
 0x6b2   : > { %v3751_v0 = vsel %vm1761_vm2, %v2744_v48, %v3749_v50 }
 0x6b3   : > { %3753 = vst.msk [vmem:[%s400_s19] sm:$0xff] %vm3752_vm6, %v3751_v0 }
 0x6b4   : > { %4545 = shalt.err (!%p4542_p5)
}
 0x6b5   : > { %s4546_s29 = scalar_lea.hbm %s5174_s11, 128  ;;  %s4550_s30 = scalar_lea.hbm %s5230_s6, 256 }
 0x6b6   : > { %p4547_p0 = scmp.ne.s32.totalorder %s5174_s11, %s4546_s29  ;;  %p4551_p12 = scmp.lt.u32.totalorder %s5174_s11, %s5230_s6 }
 0x6b7   : > { %p4552_p10 = scmp.lt.u32.totalorder %s4550_s30, %s4546_s29  ;;  %p4554_p7 = scmp.lt.u32.totalorder %s4546_s29, %s5174_s11 }
 0x6b8   : > { %p4548_p3 = pnand %p4547_p0, %p5264_p8 }
 0x6b9   : > { %p4553_p4 = por %p4552_p10, %p4551_p12 }
 0x6ba   : > { %p4549_p1 = pneg %p4548_p3 }
 0x6bb   : > { %p4555_p9 = por %p4554_p7, %p4553_p4 }
 0x6bd   : > { %p4556_p6 = pnand %p4555_p9, %p4549_p1 }
 0x6bf   : > { %4559 = shalt.err (!%p4556_p6)
}
 0x6c0   : > { %4317 = dma.vmem_to_hbm [thread:$0]  (%p5264_p8), %s5176_s23, 128, %s5174_s11, %s3755_s8  }
 0x6c1 PF: > { %s5265_s7 = sld [smem:[#allocation15_spill]]  ;;  %s5266_s25 = sld [smem:[#allocation21_spill]] }
 0x6c2   : > { %s5267_s26 = sld [smem:[#allocation18_spill]] }
 0x6c7   : > { %s3781_s15 = sand.u32 1, %s5265_s7   ;;  %p5268_p13 = scmp.ne.s32.totalorder %s5266_s25, 0 }
 0x6c8   : > { %p5269_p11 = scmp.ge.s32.totalorder %s5267_s26, 2  ;;  %s3782_s13 = scalar_lea.sflag [#allocation4], %s3781_s15 }
 0x6ca   : > { %p4333_p2 = pnand %p5269_p11, %p5268_p13 }
 0x6cc   : > { %4597 = dma.done.wait (!%p4333_p2), %s3782_s13, 128  }
 0x6cd   : > { %4599 = vsyncadd (!%p4333_p2), %s3782_s13, 4294967168  ;;  %s28_s26 = sadd.s32 1, %s5267_s26   ;;  %s5270_s14 = sld [smem:[#allocation16_spill]] }
 0x6ce   : > { %p25_p5 = scmp.ge.s32.totalorder %s28_s26, 4   ;;  %s5271_s23 = sld [smem:[#allocation20_spill]] }
 0x6cf   : > { %s5272_s24 = sld [smem:[#allocation17_spill]]  ;;  %s5273_s25 = sld [smem:[#allocation19_spill]] }
 0x6d0   : > { %s5274_s21 = smov %s4606_s22  ;;  %27 = sbr.rel (!%p25_p5) target bundleno = 12 (0xc), region = 128 }
 0x6d3   : > { %s5275_s22 = smov %s5270_s14 }
 0x6d7   :  { %3787 = vsyncpa [#allocation3], 1 }
 0x6d8   :  { %3789 = vsyncpa [#allocation3 + $0x1], 1 }
 0x6d9   :  { %3790 = vsyncpa [#allocation6], 1 }
 0x6da   :  { %3792 = vsyncpa [#allocation6 + $0x1], 1 }
 0x6db   :  { %3793 = vsyncpa [#allocation9], 1 }
 0x6dc   :  { %3795 = vsyncpa [#allocation9 + $0x1], 1 }
 0x6dd   :  { %3796 = vsyncpa [#allocation4], 1 }
 0x6de   :  { %3798 = vsyncpa [#allocation4 + $0x1], 1 }

// kernel: tpu_custom_call.1
= control target key start
LH: loop header
LB: loop body
LE: loop exit
PB: predicated region body
PF: predicated region fallthrough
CT: control target
= control target key end

     0   :  { %s5224_s0 = inlined_call_operand.hbm [shape: f32[2,8,32], index: 0, kind: input, shape index: {}]   ;;  %s5225_s1 = inlined_call_operand.hbm [shape: f32[2,8,32], index: 1, kind: input, shape index: {}]   ;;  %s5226_s2 = inlined_call_operand.hbm [shape: f32[2,8,32], index: 2, kind: input, shape index: {}]   ;;  %s5227_s3 = inlined_call_operand.hbm [shape: f32[2,8,32], index: 3, kind: input, shape index: {}]   ;;  %s5228_s4 = inlined_call_operand.vmem [shape: f32[3,8,8], index: 4, kind: input, shape index: {}]   ;;  %s5229_s5 = inlined_call_operand.vmem [shape: f32[8,3], index: 5, kind: input, shape index: {}]   ;;  %s5230_s6 = inlined_call_operand.hbm [shape: f32[2,8,32], index: 6, kind: output, shape index: {}]  }
   0x1   :  { %5242 = sst [smem:[#allocation22_spill]] %s5225_s1 }
   0x2   :  { %11 = vsyncpa [#allocation3], 0 }
   0x3   :  { %13 = vsyncpa [#allocation3 + $0x1], 0 }
   0x4   :  { %14 = vsyncpa [#allocation6], 0 }
   0x5   :  { %16 = vsyncpa [#allocation6 + $0x1], 0 }
   0x6   :  { %17 = vsyncpa [#allocation9], 0 }
   0x7   :  { %19 = vsyncpa [#allocation9 + $0x1], 0 }
   0x8   :  { %20 = vsyncpa [#allocation4], 0 }
   0x9   :  { %22 = vsyncpa [#allocation4 + $0x1], 0  ;;  %s4671_s21 = smov 0   ;;  %s4673_s22 = smov 0  }
   0xa   :  { %s4675_s23 = smov 0   ;;  %s4677_s24 = smov 0  }
   0xb   :  { %s4679_s25 = smov 0   ;;  %s4681_s26 = smov 0  }
   0xc LB: > { %5243 = sst [smem:[#allocation15_spill]] %s4602_s21  ;;  %s4702_s27 = sadd.s32 4294967295, %s4622_s26   ;;  %s4622_s26 = sphi %s4681_s26, %s28_s26   ;;  %s4618_s25 = sphi %s4679_s25, %s5273_s25   ;;  %s4614_s24 = sphi %s4677_s24, %s5272_s24   ;;  %s4610_s23 = sphi %s4675_s23, %s5271_s23   ;;  %s4606_s22 = sphi %s4673_s22, %s5275_s22   ;;  %s4602_s21 = sphi %s4671_s21, %s5274_s21  }
   0xd   : > { %5244 = sst [smem:[#allocation16_spill]] %s4610_s23  ;;  %s3919_s28 = sadd.s32 4294967294, %s4622_s26  }
   0xe   : > { %5245 = sst [smem:[#allocation17_spill]] %s4618_s25  ;;  %s40_s29 = sadd.s32 1, %s4618_s25 }
   0xf   : > { %5246 = sst [smem:[#allocation18_spill]] %s4622_s26  ;;  %s49_s30 = sadd.s32 1, %s4610_s23 }
  0x10   : > { %p42_p0 = scmp.ge.s32.totalorder %s40_s29, 2  ;;  %p56_p1 = scmp.ne.s32.totalorder %s4610_s23, %s4606_s22 }
  0x11   : > { %p57_p2 = scmp.eq.s32.totalorder %s4622_s26, 0  ;;  %p62_p3 = scmp.ne.s32.totalorder %s4606_s22, %s4602_s21 }
  0x12   : > { %s5277_s29 = smov (%p42_p0, %s40_s29), 0  ;;  %p63_p5 = scmp.eq.s32.totalorder %s4702_s27, 0 }
  0x13   : > { %5247 = sst [smem:[#allocation19_spill]] %s5277_s29  ;;  %p4714_p4 = por %p57_p2, %p56_p1 }
  0x14   : > { %s44_s8 = ssub.s32 %s4618_s25, %s5277_s29  ;;  %p214_p6 = scmp.eq.s32.totalorder %s4702_s27, 1 }
  0x15   : > { %p47_p7 = scmp.eq.s32.totalorder %s44_s8, 0  ;;  %p4722_p8 = por %p63_p5, %p62_p3 }
  0x16   : > { %p4726_p9 = por %p214_p6, %p56_p1  ;;  %p220_p10 = scmp.eq.s32.totalorder %s3919_s28, 1 }
  0x17   : > { %s5249_s9 = scalar_select %p4722_p8, 1, 0 }
  0x18   : > { %s5250_s10 = scalar_select %p4726_p9, 1, 0 }
  0x19   : > { %s4731_s11 = scalar_select %p47_p7, %s4610_s23, %s49_s30  }
  0x1a   : > { %p4733_p11 = por %p220_p10, %p62_p3  ;;  %p4336_p13 = scmp.lt.s32.totalorder %s4622_s26, 2 }
  0x1b   : > { %5251 = sst [smem:[#allocation20_spill]] %s4731_s11  ;;  %s4740_s13 = sand.u32 1, %s4610_s23  }
  0x1c   : > { %s5252_s12 = scalar_select %p4733_p11, 1, 0 }
  0x1d   : > { %s4743_s14 = sshll.u32 %s4740_s13, 3  ;;  %s4746_s15 = sshll.u32 %s4618_s25, 7 }
  0x1e   : > { %5253 = sst [smem:[#allocation21_spill]] %s5252_s12  ;;  %p4750_p0 = pnand %p4336_p13, %p4714_p4 }
  0x1f   : > { %s265_s17 = sand.u32 1, %s4622_s26   ;;  %s5255_s1 = sld [smem:[#allocation22_spill]] }
  0x20   : > { %s5254_s16 = scalar_select %p4750_p0, 1, 0 }
  0x21   : > { %s269_s28 = scalar_lea.vmem [#allocation5], %s4743_s14  ;;  %s4766_s7 = scalar_lea.sflag [#allocation6], %s265_s17 }
  0x22   : > { %s277_s30 = sshll.u32 %s269_s28, 4  ;;  %p4772_p4 = pneg %p4750_p0  ;;  %s4763_s30 = int_to_ptr.vmem [resolvable:$true] %s277_s30 }
  0x25   : > { %s4759_s20 = scalar_lea.hbm %s5255_s1, %s4746_s15  ;;  %s4417_s28 = scalar_lea.hbm %s5255_s1, 256 }
  0x26   : > { %s4412_s8 = scalar_lea.hbm %s4759_s20, 128  ;;  %p4418_p7 = scmp.lt.u32.totalorder %s4759_s20, %s5255_s1 }
  0x27   : > { %p4413_p3 = scmp.ne.s32.totalorder %s4759_s20, %s4412_s8  ;;  %p4419_p10 = scmp.lt.u32.totalorder %s4417_s28, %s4412_s8 }
  0x28   : > { %p4421_p12 = scmp.lt.u32.totalorder %s4412_s8, %s4759_s20 }
  0x29   : > { %p4415_p5 = pnand %p4772_p4, %p4413_p3  ;;  %p4420_p13 = por %p4419_p10, %p4418_p7 }
  0x2b   : > { %p4416_p6 = pneg %p4415_p5  ;;  %p4422_p1 = por %p4421_p12, %p4420_p13 }
  0x2d   : > { %p4423_p2 = pnand %p4422_p1, %p4416_p6 }
  0x2f   : > { %4426 = shalt.err (!%p4423_p2)
}
  0x30   : > { %s4427_s17 = scalar_lea.vmem %s4763_s30, 128  ;;  %s4624_s18 = smov [#allocation5]  }
  0x31   : > { %p4428_p3 = scmp.ne.s32.totalorder %s4763_s30, %s4427_s17  ;;  %s4432_s19 = sshll.u32 %s4624_s18, 4  ;;  %s4433_s19 = int_to_ptr.vmem [resolvable:$false] %s4432_s19 }
  0x32   : > { %s4434_s25 = scalar_lea.vmem %s4433_s19, 256  ;;  %p4435_p9 = scmp.lt.s32.totalorder %s4763_s30, %s4433_s19 }
  0x33   : > { %p4430_p5 = pnand %p4428_p3, %p4772_p4  ;;  %p4436_p8 = scmp.lt.s32.totalorder %s4434_s25, %s4427_s17 }
  0x35   : > { %p4431_p11 = pneg %p4430_p5  ;;  %p4437_p7 = por %p4436_p8, %p4435_p9 }
  0x37   : > { %p4438_p10 = pnand %p4437_p7, %p4431_p11 }
  0x39   : > { %4441 = shalt.err (!%p4438_p10)
}
  0x3a   : > { %4325 = dma.hbm_to_vmem [thread:$0]  (!%p4750_p0), %s4759_s20, 128, %s4763_s30, %s4766_s7  }
  0x3b   : > { %p5257_p12 = scmp.lt.s32.totalorder %s4622_s26, 3  ;;  %p5258_p1 = scmp.ge.s32.totalorder %s4622_s26, 1 }
  0x3c   : > { %s4808_s17 = scalar_lea.hbm %s5224_s0, %s4746_s15  ;;  %s250_s18 = scalar_lea.vmem [#allocation2], %s4743_s14 }
  0x3d   : > { %p4800_p2 = pnand %p5258_p1, %p5257_p12  ;;  %s258_s19 = sshll.u32 %s250_s18, 4  ;;  %s4811_s19 = int_to_ptr.vmem [resolvable:$true] %s258_s19 }
  0x3e   : > { %s4817_s25 = scalar_lea.hbm %s5226_s2, %s4746_s15  ;;  %s247_s1 = scalar_lea.sflag [#allocation3], %s4740_s13 }
  0x3f   : > { %s5259_s11 = scalar_select %p4800_p2, 1, 0 }
  0x40   : > { %s4442_s23 = scalar_lea.hbm %s4808_s17, 128  ;;  %s4447_s26 = scalar_lea.hbm %s5224_s0, 256 }
  0x41   : > { %p4443_p8 = scmp.ne.s32.totalorder %s4808_s17, %s4442_s23  ;;  %p4448_p6 = scmp.lt.u32.totalorder %s4808_s17, %s5224_s0 }
  0x42   : > { %p4449_p13 = scmp.lt.u32.totalorder %s4447_s26, %s4442_s23  ;;  %p4451_p5 = scmp.lt.u32.totalorder %s4442_s23, %s4808_s17 }
  0x43   : > { %p4445_p9 = pnand %p4443_p8, %p4772_p4 }
  0x44   : > { %p4450_p3 = por %p4449_p13, %p4448_p6 }
  0x45   : > { %p4446_p11 = pneg %p4445_p9 }
  0x46   : > { %p4452_p7 = por %p4451_p5, %p4450_p3 }
  0x48   : > { %p4453_p10 = pnand %p4452_p7, %p4446_p11 }
  0x4a   : > { %4456 = shalt.err (!%p4453_p10)
}
  0x4b   : > { %s4457_s18 = scalar_lea.vmem %s4811_s19, 128  ;;  %s4625_s20 = smov [#allocation2]  }
  0x4c   : > { %p4458_p12 = scmp.ne.s32.totalorder %s4811_s19, %s4457_s18  ;;  %s4462_s30 = sshll.u32 %s4625_s20, 4  ;;  %s4463_s30 = int_to_ptr.vmem [resolvable:$false] %s4462_s30 }
  0x4d   : > { %s4464_s21 = scalar_lea.vmem %s4463_s30, 256  ;;  %p4465_p9 = scmp.lt.s32.totalorder %s4811_s19, %s4463_s30 }
  0x4e   : > { %p4460_p1 = pnand %p4458_p12, %p4772_p4  ;;  %p4466_p2 = scmp.lt.s32.totalorder %s4464_s21, %s4457_s18 }
  0x50   : > { %p4461_p8 = pneg %p4460_p1  ;;  %p4467_p6 = por %p4466_p2, %p4465_p9 }
  0x52   : > { %p4468_p13 = pnand %p4467_p6, %p4461_p8 }
  0x54   : > { %4471 = shalt.err (!%p4468_p13)
}
  0x55   : > { %4322 = dma.hbm_to_vmem [thread:$0]  (!%p4750_p0), %s4808_s17, 128, %s4811_s19, %s247_s1  }
  0x56   : > { %s288_s23 = scalar_lea.vmem [#allocation7], %s4743_s14  ;;  %s4472_s12 = scalar_lea.hbm %s4817_s25, 128 }
  0x57   : > { %s296_s26 = sshll.u32 %s288_s23, 4  ;;  %p4473_p11 = scmp.ne.s32.totalorder %s4817_s25, %s4472_s12  ;;  %s297_s26 = int_to_ptr.vmem [resolvable:$true] %s296_s26 }
  0x58   : > { %s4477_s18 = scalar_lea.hbm %s5226_s2, 256  ;;  %p4478_p5 = scmp.lt.u32.totalorder %s4817_s25, %s5226_s2 }
  0x59   : > { %p4475_p2 = pnand %p4473_p11, %p4772_p4  ;;  %p4479_p7 = scmp.lt.u32.totalorder %s4477_s18, %s4472_s12 }
  0x5a   : > { %p4481_p12 = scmp.lt.u32.totalorder %s4472_s12, %s4817_s25 }
  0x5b   : > { %p4476_p3 = pneg %p4475_p2  ;;  %p4480_p10 = por %p4479_p7, %p4478_p5 }
  0x5d   : > { %p4482_p1 = por %p4481_p12, %p4480_p10 }
  0x5f   : > { %p4483_p8 = pnand %p4482_p1, %p4476_p3 }
  0x61   : > { %4486 = shalt.err (!%p4483_p8)
}
  0x62   : > { %s4487_s1 = scalar_lea.vmem %s297_s26, 128  ;;  %s4626_s17 = smov [#allocation7]  }
  0x63   : > { %p4488_p9 = scmp.ne.s32.totalorder %s297_s26, %s4487_s1  ;;  %s4492_s19 = sshll.u32 %s4626_s17, 4  ;;  %s4493_s19 = int_to_ptr.vmem [resolvable:$false] %s4492_s19 }
  0x64   : > { %s4494_s21 = scalar_lea.vmem %s4493_s19, 256  ;;  %p4495_p11 = scmp.lt.s32.totalorder %s297_s26, %s4493_s19 }
  0x65   : > { %p4490_p6 = pnand %p4488_p9, %p4772_p4  ;;  %p4496_p2 = scmp.lt.s32.totalorder %s4494_s21, %s4487_s1 }
  0x67   : > { %p4491_p13 = pneg %p4490_p6  ;;  %p4497_p0 = por %p4496_p2, %p4495_p11 }
  0x69   : > { %p4498_p5 = pnand %p4497_p0, %p4491_p13 }
  0x6b   : > { %4501 = shalt.err (!%p4498_p5)
}
  0x6c   : > { %p5260_p7 = scmp.ne.s32.totalorder %s5254_s16, 0  ;;  %s4864_s8 = scalar_lea.hbm %s5227_s3, %s4746_s15 }
  0x6d   : > { %s307_s28 = scalar_lea.vmem [#allocation8], %s4743_s14  ;;  %s304_s20 = scalar_lea.sflag [#allocation9], %s4740_s13 }
  0x6e   : > { %4328 = dma.hbm_to_vmem [thread:$0]  (!%p5260_p7), %s4817_s25, 128, %s297_s26, %s4766_s7  }
  0x6f   : > { %s315_s18 = sshll.u32 %s307_s28, 4  ;;  %s4502_s30 = scalar_lea.hbm %s4864_s8, 128  ;;  %s316_s18 = int_to_ptr.vmem [resolvable:$true] %s315_s18 }
  0x70   : > { %p4503_p0 = scmp.ne.s32.totalorder %s4864_s8, %s4502_s30  ;;  %s4507_s25 = scalar_lea.hbm %s5227_s3, 256 }
  0x71   : > { %p4508_p12 = scmp.lt.u32.totalorder %s4864_s8, %s5227_s3  ;;  %p4509_p1 = scmp.lt.u32.totalorder %s4507_s25, %s4502_s30 }
  0x72   : > { %p4505_p3 = pnand %p4503_p0, %p4772_p4  ;;  %p4511_p9 = scmp.lt.u32.totalorder %s4502_s30, %s4864_s8 }
  0x73   : > { %p4510_p8 = por %p4509_p1, %p4508_p12 }
  0x74   : > { %p4506_p10 = pneg %p4505_p3 }
  0x75   : > { %p4512_p6 = por %p4511_p9, %p4510_p8 }
  0x77   : > { %p4513_p13 = pnand %p4512_p6, %p4506_p10 }
  0x79   : > { %4516 = shalt.err (!%p4513_p13)
}
  0x7a   : > { %s4517_s13 = scalar_lea.vmem %s316_s18, 128  ;;  %s4627_s14 = smov [#allocation8]  }
  0x7b   : > { %p4518_p11 = scmp.ne.s32.totalorder %s316_s18, %s4517_s13  ;;  %s4522_s17 = sshll.u32 %s4627_s14, 4  ;;  %s4523_s17 = int_to_ptr.vmem [resolvable:$false] %s4522_s17 }
  0x7c   : > { %s4524_s19 = scalar_lea.vmem %s4523_s17, 256  ;;  %p4525_p0 = scmp.lt.s32.totalorder %s316_s18, %s4523_s17 }
  0x7d   : > { %p4520_p2 = pnand %p4518_p11, %p4772_p4  ;;  %p4526_p3 = scmp.lt.s32.totalorder %s4524_s19, %s4517_s13 }
  0x7f   : > { %p4521_p5 = pneg %p4520_p2  ;;  %p4527_p7 = por %p4526_p3, %p4525_p0 }
  0x81   : > { %p4528_p1 = pnand %p4527_p7, %p4521_p5 }
  0x83   : > { %4531 = shalt.err (!%p4528_p1)
}
  0x84   : > { %p5261_p12 = scmp.ne.s32.totalorder %s5254_s16, 0  ;;  %p5262_p10 = scmp.ne.s32.totalorder %s5259_s11, 0 }
  0x85   : > { %s4888_s29 = sand.u32 (!%p5262_p10), 1, %s4606_s22   ;;  %p5263_p4 = scmp.ne.s32.totalorder (!%p5262_p10), %s5249_s9, 0 }
  0x86   : > { %4331 = dma.hbm_to_vmem [thread:$0]  (!%p5261_p12), %s4864_s8, 128, %s316_s18, %s304_s20  }
  0x87   : > { %324 = sbr.rel (%p5262_p10) target bundleno = 1729 (0x6c1), region = 44  ;;  %s4891_s21 = sshll.u32 (!%p5262_p10), %s4888_s29, 3 }
  0x88   : > { %s327_s23 = scalar_lea.sflag (!%p5262_p10), [#allocation3], %s4888_s29  ;;  %s330_s12 = scalar_lea.vmem (!%p5262_p10), [#allocation2], %s4891_s21 }
  0x8e   : > { %4585 = dma.done.wait (%p5263_p4), %s327_s23, 128  }
  0x8f   : > { %4587 = vsyncadd (%p5263_p4), %s327_s23, 4294967168  ;;  %s335_s16 = sand.u32 1, %s4702_s27   ;;  %s339_s8 = scalar_lea.vmem [#allocation5], %s4891_s21 }
  0x90   : > { %s336_s11 = scalar_lea.sflag [#allocation6], %s335_s16 }
  0x91   : > { %4589 = dma.done.wait (%p5263_p4), %s336_s11, 256  }
  0x92   : > { %4591 = vsyncadd (%p5263_p4), %s336_s11, 4294967040  ;;  %s348_s28 = scalar_lea.vmem [#allocation7], %s4891_s21  ;;  %s354_s18 = scalar_lea.sflag [#allocation9], %s4888_s29 }
  0x93   : > { %s357_s20 = scalar_lea.vmem [#allocation8], %s4891_s21 }
  0x94   : > { %4593 = dma.done.wait (%p5263_p4), %s354_s18, 128  }
  0x95   : > { %4595 = vsyncadd (%p5263_p4), %s354_s18, 4294967168  ;;  %v4628_v0 = vmov 0.0   ;;  %vm4629_vm0 = vmmov 0   ;;  %vm411_vm1 = vcmask 64512   ;;  %v402_v1 = vld [vmem:[%s339_s8] sm:$0xff]  ;;  %v4921_v2 = vld [vmem:[%s5228_s4] sm:$0xff] }
  0x96   : > { %4041 = vmatprep.subr.mxu0 %v4628_v0  ;;  %4043 = vmatprep.mubr.msk.f32.mxu0 %vm4629_vm0, %v4628_v0  ;;  %v4923_v3 = vand.u32 4294901760, %v402_v1  ;;  %v413_v4 = vsel %vm411_vm1, %v4921_v2, 0  ;;  %v4930_v6 = vld [vmem:[%s5228_s4 + $0x10] sm:$0xff]  ;;  %v4944_v12 = vld [vmem:[%s5228_s4 + $0x8] sm:$0xff]  ;;  %s4630_s26 = smov 112   ;;  %vm1761_vm2 = vcmask 130048  }
  0x97   : > { %4026 = vmatprep.subr.mxu1 %v4628_v0  ;;  %4028 = vmatprep.mubr.msk.f32.mxu1 %vm4629_vm0, %v4628_v0  ;;  %v481_v5 = vand.u32 4294901760, %v413_v4  ;;  %v1311_v10 = vsel %vm411_vm1, %v4930_v6, 0  ;;  %v862_v17 = vsel %vm411_vm1, %v4944_v12, 0  ;;  %v401_v31 = vld [vmem:[%s330_s12] sm:$0xff]  ;;  %vm1778_vm3 = vcmask 7168   ;;  %s4634_s14 = smov 16  }
  0x98   : > { %4042 = vmatpush3.msra.mxu0 %v4923_v3  ;;  %4027 = vmatpush3.msra.mxu1 %v4923_v3  ;;  %v493_v7 = vsub.f32 %v402_v1, %v4923_v3  ;;  %v4947_v15 = vand.u32 4294901760, %v1311_v10  ;;  %v4956_v20 = vand.u32 4294901760, %v862_v17  ;;  %vm1780_vm4 = vcmask 15360   ;;  %v405_v60 = vld [vmem:[%s5229_s5] sm:$0xff]  ;;  %s3939_s17 = sshll.u32 %s4614_s24, 7  ;;  %s400_s19 = scalar_lea.vmem [#allocation10], %s4891_s21 }
  0x99   : > { %v482_v8 = vsub.f32 %v413_v4, %v481_v5  ;;  %4031 = vmatprep.subr.mxu1 %v4628_v0  ;;  %4046 = vmatprep.subr.mxu0 %v4628_v0  ;;  %vm1783_vm5 = vcmask 23552   ;;  %s3769_s23 = sshll.u32 %s400_s19, 4  ;;  %vm3752_vm6 = vcmask 261120   ;;  %s5174_s11 = scalar_lea.hbm %s5230_s6, %s3939_s17  ;;  %s5176_s23 = int_to_ptr.vmem [resolvable:$true] %s3769_s23 }
  0x9a   : > { %v4937_v9 = vand.u32 4294901760, %v493_v7  ;;  %v1380_v19 = vsub.f32 %v1311_v10, %v4947_v15  ;;  %v931_v22 = vsub.f32 %v862_v17, %v4956_v20  ;;  %s3755_s8 = scalar_lea.sflag [#allocation4], %s4888_s29  ;;  %p5264_p8 = scmp.ne.s32.totalorder %s5250_s10, 0 }
  0x9b   : > { %v483_v11 = vand.u32 4294901760, %v482_v8  ;;  %s4635_s24 = smov [#allocation10]  }
  0x9c   : > { %v495_v13 = vsub.f32 %v493_v7, %v4937_v9  ;;  %v1381_v21 = vand.u32 4294901760, %v1380_v19  ;;  %v932_v24 = vand.u32 4294901760, %v931_v22  ;;  %s4536_s21 = sshll.u32 %s4635_s24, 4  ;;  %s4537_s21 = int_to_ptr.vmem [resolvable:$false] %s4536_s21 }
  0x9d   : > { %4044 = vmatmul.mubr.f32.vlgmr.msra.gmra.mrb[0].mxu0 %v483_v11  ;;  %v484_v14 = vsub.f32 %v482_v8, %v483_v11  ;;  %s4538_s18 = scalar_lea.vmem %s4537_s21, 256  ;;  %p4539_p13 = scmp.lt.s32.totalorder %s5176_s23, %s4537_s21 }
  0x9e   : > { %v496_v16 = vand.u32 4294901760, %v495_v13  ;;  %4047 = vmatpush3.msra.mxu0 %v4937_v9  ;;  %4048 = vmatprep.mubr.msk.f32.mxu0 %vm4629_vm0, %v4628_v0  ;;  %v1382_v23 = vsub.f32 %v1380_v19, %v1381_v21  ;;  %v933_v26 = vsub.f32 %v931_v22, %v932_v24 }
  0x9f   : > { %v485_v18 = vand.u32 4294901760, %v484_v14  ;;  %4051 = vmatprep.subr.mxu0 %v4628_v0 }
  0xa0   : > { %v1383_v25 = vand.u32 4294901760, %v1382_v23  ;;  %v934_v27 = vand.u32 4294901760, %v933_v26  ;;  %v4631_v26 = vmov 1  }
  0xa1   : > { %4029 = vmatmul.mubr.f32.vlgmr.msra.gmra.mrb[0].mxu1 %v485_v18  ;;  %4394 = vset.pattern.permute.xlu1 %v4631_v26 }
  0xa2   : > { %4032 = vmatpush3.msra.mxu1 %v496_v16  ;;  %4033 = vmatprep.mubr.msk.f32.mxu1 %vm4629_vm0, %v4628_v0 }
  0xa3   : > { %4036 = vmatprep.subr.mxu1 %v4628_v0 }
  0xa5   : > { %4049 = vmatmul.mubr.f32.vlgmr.msra.gmra.mrb[0].mxu0 %v481_v5 }
  0xa6   : > { %4052 = vmatpush3.msra.mxu0 %v4923_v3  ;;  %4053 = vmatprep.mubr.msk.f32.mxu0 %vm4629_vm0, %v4628_v0 }
  0xa7   : > { %4086 = vmatprep.subr.mxu0 %v4628_v0 }
  0xa9   : > { %4034 = vmatmul.mubr.f32.vlgmr.msra.gmra.mrb[0].mxu1 %v481_v5 }
  0xaa   : > { %4037 = vmatpush3.msra.mxu1 %v493_v7  ;;  %4038 = vmatprep.mubr.msk.f32.mxu1 %vm4629_vm0, %v4628_v0 }
  0xab   : > { %4056 = vmatprep.subr.mxu1 %v4628_v0 }
  0xad   : > { %4054 = vmatmul.mubr.f32.vlgmr.msra.gmra.mrb[0].mxu0 %v481_v5 }
  0xae   : > { %4087 = vmatpush3.msra.mxu0 %v4923_v3  ;;  %4088 = vmatprep.mubr.msk.f32.mxu0 %vm4629_vm0, %v4628_v0 }
  0xaf   : > { %4091 = vmatprep.subr.mxu0 %v4628_v0 }
  0xb1   : > { %4039 = vmatmul.mubr.f32.vlgmr.msra.gmra.mrb[0].mxu1 %v482_v8  ;;  %4089 = vmatmul.mubr.f32.vlgmr.msra.gmra.mrb[2].mxu0 %v1383_v25 }
  0xb2   : > { %4057 = vmatpush3.msra.mxu1 %v4923_v3  ;;  %4058 = vmatprep.mubr.msk.f32.mxu1 %vm4629_vm0, %v4628_v0 }
  0xb3   : > { %4061 = vmatprep.subr.mxu1 %v4628_v0  ;;  %4092 = vmatpush3.msra.mxu0 %v496_v16 }
  0xb4   : > { %4093 = vmatprep.mubr.msk.f32.mxu0 %vm4629_vm0, %v4628_v0  ;;  %4096 = vmatprep.subr.mxu0 %v4628_v0 }
  0xb5   : > { %4059 = vmatmul.mubr.f32.vlgmr.msra.gmra.mrb[2].mxu1 %v934_v27  ;;  %v4632_v27 = vmov 0  }
  0xb6   : > { %4062 = vmatpush3.msra.mxu1 %v496_v16  ;;  %4063 = vmatprep.mubr.msk.f32.mxu1 %vm4629_vm0, %v4628_v0 }
  0xb7   : > { %4066 = vmatprep.subr.mxu1 %v4628_v0  ;;  %4393 = vset.pattern.permute.xlu0 %v4632_v27 }
  0xb9   : > { %4094 = vmatmul.mubr.f32.vlgmr.msra.gmra.mrb[2].mxu0 %v4947_v15 }
  0xba   : > { %4097 = vmatpush3.msra.mxu0 %v493_v7  ;;  %4098 = vmatprep.mubr.msk.f32.mxu0 %vm4629_vm0, %v4628_v0 }
  0xbb   : > { %4101 = vmatprep.subr.mxu0 %v4628_v0 }
  0xbd   : > { %4064 = vmatmul.mubr.f32.vlgmr.msra.gmra.mrb[2].mxu1 %v4956_v20 }
  0xbe   : > { %4067 = vmatpush3.msra.mxu1 %v493_v7  ;;  %4068 = vmatprep.mubr.msk.f32.mxu1 %vm4629_vm0, %v4628_v0 }
  0xbf   : > { %4071 = vmatprep.subr.mxu1 %v4628_v0 }
  0xc1   : > { %4099 = vmatmul.mubr.f32.vlgmr.msra.gmra.mrb[2].mxu0 %v1380_v19 }
  0xc2   : > { %4102 = vmatpush3.msra.mxu0 %v4923_v3  ;;  %4103 = vmatprep.mubr.msk.f32.mxu0 %vm4629_vm0, %v4628_v0 }
  0xc3   : > { %4106 = vmatprep.subr.mxu0 %v4628_v0 }
  0xc5   : > { %4069 = vmatmul.mubr.f32.vlgmr.msra.gmra.mrb[2].mxu1 %v931_v22 }
  0xc6   : > { %4072 = vmatpush3.msra.mxu1 %v4923_v3  ;;  %4073 = vmatprep.mubr.msk.f32.mxu1 %vm4629_vm0, %v4628_v0 }
  0xc7   : > { %4076 = vmatprep.subr.mxu1 %v4628_v0 }
  0xc9   : > { %4104 = vmatmul.mubr.f32.vlgmr.msra.gmra.mrb[2].mxu0 %v1381_v21 }
  0xca   : > { %4107 = vmatpush3.msra.mxu0 %v4937_v9  ;;  %4108 = vmatprep.mubr.msk.f32.mxu0 %vm4629_vm0, %v4628_v0 }
  0xcb   : > { %4111 = vmatprep.subr.mxu0 %v4628_v0 }
  0xcd   : > { %4074 = vmatmul.mubr.f32.vlgmr.msra.gmra.mrb[2].mxu1 %v932_v24 }
  0xce   : > { %4077 = vmatpush3.msra.mxu1 %v4937_v9  ;;  %4078 = vmatprep.mubr.msk.f32.mxu1 %vm4629_vm0, %v4628_v0 }
  0xcf   : > { %4081 = vmatprep.subr.mxu1 %v4628_v0 }
  0xd1   : > { %4109 = vmatmul.mubr.f32.vlgmr.msra.gmra.mrb[2].mxu0 %v4947_v15 }
  0xd2   : > { %4112 = vmatpush3.msra.mxu0 %v4923_v3  ;;  %4113 = vmatprep.mubr.msk.f32.mxu0 %vm4629_vm0, %v4628_v0 }
  0xd3   : > { %4176 = vmatprep.subr.mxu0 %v4628_v0 }
  0xd5   : > { %4079 = vmatmul.mubr.f32.vlgmr.msra.gmra.mrb[2].mxu1 %v4956_v20 }
  0xd6   : > { %4082 = vmatpush3.msra.mxu1 %v4923_v3  ;;  %4083 = vmatprep.mubr.msk.f32.mxu1 %vm4629_vm0, %v4628_v0 }
  0xd7   : > { %4116 = vmatprep.subr.mxu1 %v4628_v0 }
  0xd9   : > { %4114 = vmatmul.mubr.f32.vlgmr.msra.gmra.mrb[2].mxu0 %v4947_v15 }
  0xda   : > { %4178 = vmatprep.mubr.msk.f32.mxu0 %vm4629_vm0, %v4628_v0 }
  0xdd   : > { %4084 = vmatmul.mubr.f32.vlgmr.msra.gmra.mrb[2].mxu1 %v4956_v20 }
  0xde   : > { %4118 = vmatprep.mubr.msk.f32.mxu1 %vm4629_vm0, %v4628_v0 }
 0x180   : > { %v857_v28 = vpop.f32.mrb[0].mxu0 }
 0x181   : > { %v4055_v29 = vpop.f32.mrb[1].mxu0 }
 0x184   : > { %v637_v30 = vpop.f32.mrb[0].mxu1 }
 0x185   : > { %v4236_v32 = vadd.f32 %v857_v28, %v637_v30  ;;  %v4040_v33 = vpop.f32.mrb[1].mxu1  ;;  %v5045_v28 = vld [vmem:[%s357_s20] sm:$0xff] }
 0x186   : > { %v5048_v29 = vand.u32 4294901760, %v5045_v28 }
 0x187   : > { %v1759_v34 = vsub.f32 %v401_v31, %v4236_v32 }
 0x188   : > { %4117 = vmatpush3.msra.mxu1 %v5048_v29 }
 0x189   : > { %v1760_v35 = vand.u32 2147483647, %v1759_v34  ;;  %4121 = vmatprep.subr.mxu1 %v4628_v0 }
 0x18b   : > { %2749 = vrot.lane.b32.xlu0 %v1760_v35, %s4630_s26  ;;  %v1762_v46 = vsel %vm1761_vm2, %v1760_v35, 0.0 }
 0x1ac   : > { %v1755_v36 = vpop.f32.mrb[2].mxu0 }
 0x1ad   : > { %v1772_v37 = vsub.f32 %v401_v31, %v1755_v36  ;;  %v4115_v38 = vpop.f32.mrb[3].mxu0 }
 0x1af   : > { %v1773_v39 = vand.u32 2147483647, %v1772_v37 }
 0x1b0   : > { %v1306_v40 = vpop.f32.mrb[2].mxu1 }
 0x1b1   : > { %v1766_v41 = vsub.f32 %v401_v31, %v1306_v40  ;;  %v4085_v42 = vpop.f32.mrb[3].mxu1  ;;  %2765 = vrot.lane.b32.xlu1 %v1773_v39, %s4630_s26  ;;  %v1774_v47 = vsel %vm1761_vm2, %v1773_v39, 0.0 }
 0x1b2   : > { %v5054_v42 = vld [vmem:[%s348_s28] sm:$0xff]  ;;  %s4532_s28 = scalar_lea.vmem %s5176_s23, 128 }
 0x1b3   : > { %v1767_v43 = vand.u32 2147483647, %v1766_v41  ;;  %p4533_p7 = scmp.ne.s32.totalorder %s5176_s23, %s4532_s28  ;;  %p4540_p11 = scmp.lt.s32.totalorder %s4538_s18, %s4532_s28 }
 0x1b5   : > { %2757 = vrot.lane.b32.xlu0 %v1767_v43, %s4630_s26  ;;  %v1768_v52 = vsel %vm1761_vm2, %v1767_v43, 0.0  ;;  %v4633_v43 = vmov 2   ;;  %p4534_p9 = pnand %p4533_p7, %p5264_p8  ;;  %p4541_p2 = por %p4540_p11, %p4539_p13 }
 0x1b7   : > { %p4535_p6 = pneg %p4534_p9 }
 0x1b9   : > { %p4542_p5 = pnand %p4541_p2, %p4535_p6 }
 0x1fd   : > { %v2750_v44 = vpop.permute.xlu0 %2749 }
 0x1fe   : > { %v2752_v45 = vsel %vm1761_vm2, %v2750_v44, 0.0 }
 0x1ff   : > { %2753 = vadd.xlane.f32.xlu1 %v2752_v45 }
 0x203   : > { %1763 = vadd.xlane.f32.xlu1 %v1762_v46 }
 0x207   : > { %1775 = vadd.xlane.f32.xlu1 %v1774_v47 }
 0x223   : > { %v2766_v50 = vpop.permute.xlu1 %2765 }
 0x224   : > { %v2768_v51 = vsel %vm1761_vm2, %v2766_v50, 0.0 }
 0x227   : > { %v2758_v48 = vpop.permute.xlu0 %2757 }
 0x228   : > { %v2760_v49 = vsel %vm1761_vm2, %v2758_v48, 0.0 }
 0x229   : > { %2761 = vadd.xlane.f32.xlu0 %v2760_v49 }
 0x22d   : > { %2769 = vadd.xlane.f32.xlu0 %v2768_v51 }
 0x231   : > { %1769 = vadd.xlane.f32.xlu0 %v1768_v52 }
 0x28c   : > { %v2754_v53 = vpop.xlane.xlu1 %2753 }
 0x28d   : > { %v2755_v57 = vmul.f32 -0.25, %v2754_v53 }
 0x290   : > { %v1764_v55 = vpop.xlane.xlu1 %1763 }
 0x291   : > { %v1765_v4 = vmul.f32 -0.25, %v1764_v55 }
 0x294   : > { %v1776_v62 = vpop.xlane.xlu1 %1775 }
 0x295   : > { %v1777_v7 = vmul.f32 -0.25, %v1776_v62 }
 0x2b6   : > { %v2762_v54 = vpop.xlane.xlu0 %2761 }
 0x2b7   : > { %v2763_v56 = vmul.f32 -0.25, %v2762_v54 }
 0x2b9   : > { %v2772_v61 = vsel %vm1778_vm3, %v2755_v57, %v2763_v56 }
 0x2ba   : > { %v2770_v58 = vpop.xlane.xlu0 %2769 }
 0x2bb   : > { %v2771_v59 = vmul.f32 -0.25, %v2770_v58 }
 0x2bd   : > { %v2773_v63 = vsel %vm1780_vm4, %v2772_v61, %v2771_v59 }
 0x2be   : > { %v1770_v1 = vpop.xlane.xlu0 %1769  ;;  %v2774_v3 = vadd.f32 %v2773_v63, %v405_v60 }
 0x2bf   : > { %v1771_v5 = vmul.f32 -0.25, %v1770_v1 }
 0x2c0   : > { %v2775_v8 = vsel %vm1783_vm5, %v2774_v3, -inf }
 0x2c1   : > { %v1779_v9 = vsel %vm1778_vm3, %v1765_v4, %v1771_v5  ;;  %2776 = vmax.xlane.f32.xlu0 %v2775_v8 }
 0x2c2   : > { %v1781_v10 = vsel %vm1780_vm4, %v1779_v9, %v1777_v7 }
 0x2c3   : > { %v1782_v11 = vadd.f32 %v1781_v10, %v405_v60 }
 0x2c5   : > { %v1784_v13 = vsel %vm1783_vm5, %v1782_v11, -inf }
 0x2c6   : > { %1785 = vmax.xlane.f32.xlu1 %v1784_v13  ;;  %v1931_v13 = vsub.f32 %v5045_v28, %v5048_v29 }
 0x34e   : > { %v2777_v14 = vpop.xlane.xlu0 %2776 }
 0x34f   : > { %v2778_v15 = vmax.f32 %v2777_v14, 0.0 }
 0x351   : > { %v2779_v16 = vsub.f32 %v2774_v3, %v2778_v15  ;;  %v2785_v30 = vsub.f32 0.0, %v2778_v15  ;;  %v1932_v15 = vand.u32 4294901760, %v1931_v13 }
 0x353   : > { %v2780_v17 = vmul.f32 1.442695, %v2779_v16  ;;  %v1786_v18 = vpop.xlane.xlu1 %1785  ;;  %v2786_v31 = vmul.f32 1.442695, %v2785_v30 }
 0x354   : > { %v1787_v19 = vmax.f32 %v1786_v18, 0.0 }
 0x355   : > { %4400 = vpow2.f32 %v2780_v17 }
 0x356   : > { %v1788_v20 = vsub.f32 %v1782_v11, %v1787_v19  ;;  %v1794_v32 = vsub.f32 0.0, %v1787_v19  ;;  %v1933_v19 = vsub.f32 %v1931_v13, %v1932_v15 }
 0x358   : > { %v1789_v21 = vmul.f32 1.442695, %v1788_v20  ;;  %v1795_v33 = vmul.f32 1.442695, %v1794_v32 }
 0x35a   : > { %4402 = vpow2.f32 %v1789_v21 }
 0x35b   : > { %4404 = vpow2.f32 %v2786_v31 }
 0x35c   : > { %4406 = vpow2.f32 %v1795_v33 }
 0x35f   : > { %v4401_v22 = vpop.eup %4400 }
 0x360   : > { %v2782_v23 = vsel %vm1783_vm5, %v4401_v22, 0.0 }
 0x361   : > { %2783 = vadd.xlane.f32.xlu0 %v2782_v23 }
 0x364   : > { %v4403_v24 = vpop.eup %4402 }
 0x365   : > { %v1791_v25 = vsel %vm1783_vm5, %v4403_v24, 0.0  ;;  %v4405_v34 = vpop.eup %4404 }
 0x366   : > { %1792 = vadd.xlane.f32.xlu1 %v1791_v25  ;;  %v4407_v38 = vpop.eup %4406 }
 0x3ee   : > { %v2784_v35 = vpop.xlane.xlu0 %2783 }
 0x3ef   : > { %v2788_v36 = vadd.f32 %v4405_v34, %v2784_v35 }
 0x3f1   : > { %4408 = vrcp.f32 %v2788_v36 }
 0x3f3   : > { %v1793_v37 = vpop.xlane.xlu1 %1792 }
 0x3f4   : > { %v1797_v39 = vadd.f32 %v4407_v38, %v1793_v37  ;;  %v2303_v37 = vand.u32 4294901760, %v5054_v42 }
 0x3f6   : > { %4410 = vrcp.f32 %v1797_v39  ;;  %v2380_v39 = vsub.f32 %v5054_v42, %v2303_v37 }
 0x3fb   : > { %v4409_v40 = vpop.eup %4408 }
 0x3fc   : > { %v2790_v41 = vmul.f32 %v4409_v40, %v4401_v22  ;;  %v1934_v22 = vand.u32 4294901760, %v1933_v19 }
 0x3fe   : > { %2793 = vperm.xlu0 %4393, %v2790_v41   ;;  %2798 = vperm.xlu1 %4394, %v2790_v41  }
 0x400   : > { %v4411_v44 = vpop.eup %4410 }
 0x401   : > { %v1799_v45 = vmul.f32 %v4411_v44, %v4403_v24 }
 0x402   : > { %4395 = vset.pattern.permute.xlu1 %v4633_v43  ;;  %3295 = vrot.lane.b32.xlu0 %v5054_v42, %s4630_s26 }
 0x403   : > { %2804 = vperm.xlu1 %4395, %v2790_v41   ;;  %v2381_v41 = vand.u32 4294901760, %v2380_v39 }
 0x407   : > { %2842 = vrot.lane.b32.xlu1 %v5045_v28, %s4630_s26 }
 0x408   : > { %4396 = vset.pattern.permute.xlu1 %v4632_v27 }
 0x40b   : > { %1802 = vperm.xlu1 %4396, %v1799_v45  }
 0x40f   : > { %4397 = vset.pattern.permute.xlu1 %v4631_v26 }
 0x410   : > { %1807 = vperm.xlu1 %4397, %v1799_v45  }
 0x414   : > { %4398 = vset.pattern.permute.xlu1 %v4633_v43 }
 0x415   : > { %1813 = vperm.xlu1 %4398, %v1799_v45  }
 0x47d   : > { %v2794_v46 = vpop.permute.xlu0 %2793  ;;  %v2799_v47 = vpop.permute.xlu1 %2798 }
 0x47e   : > { %v2796_v48 = vmul.f32 %v2794_v46, %v4921_v2  ;;  %v2801_v49 = vmul.f32 %v4944_v12, %v2799_v47 }
 0x480   : > { %v2802_v51 = vadd.f32 %v2801_v49, %v2796_v48 }
 0x482   : > { %v2805_v50 = vpop.permute.xlu1 %2804 }
 0x483   : > { %v2807_v52 = vmul.f32 %v4930_v6, %v2805_v50 }
 0x485   : > { %v2808_v53 = vadd.f32 %v2807_v52, %v2802_v51 }
 0x486   : > { %v2843_v54 = vpop.permute.xlu1 %2842 }
 0x487   : > { %v5063_v55 = vand.u32 4294901760, %v2843_v54  ;;  %2809 = vxpose.xlu1.b32.start.end [1/1] (short) (narrow) %v2808_v53, 8  ;;  %v3299_v24 = vsel %vm411_vm1, %v2808_v53, 0 }
 0x488   : > { %v5104_v26 = vand.u32 4294901760, %v3299_v24 }
 0x489   : > { %4177 = vmatpush3.msra.mxu0 %v5063_v55  ;;  %v2926_v1 = vsub.f32 %v2843_v54, %v5063_v55 }
 0x48a   : > { %v1803_v56 = vpop.permute.xlu1 %1802  ;;  %4181 = vmatprep.subr.mxu0 %v4628_v0  ;;  %v3368_v28 = vsub.f32 %v3299_v24, %v5104_v26 }
 0x48b   : > { %v1805_v59 = vmul.f32 %v1803_v56, %v4921_v2  ;;  %v2927_v7 = vand.u32 4294901760, %v2926_v1 }
 0x48c   : > { %v3369_v31 = vand.u32 4294901760, %v3368_v28 }
 0x48d   : > { %v2928_v9 = vsub.f32 %v2926_v1, %v2927_v7 }
 0x48e   : > { %v3370_v33 = vsub.f32 %v3368_v28, %v3369_v31 }
 0x48f   : > { %v1808_v57 = vpop.permute.xlu1 %1807  ;;  %v2929_v11 = vand.u32 4294901760, %v2928_v9 }
 0x490   : > { %v1810_v58 = vmul.f32 %v4944_v12, %v1808_v57  ;;  %v3371_v36 = vand.u32 4294901760, %v3370_v33 }
 0x492   : > { %v1811_v61 = vadd.f32 %v1810_v58, %v1805_v59 }
 0x494   : > { %v1814_v60 = vpop.permute.xlu1 %1813 }
 0x495   : > { %v1816_v62 = vmul.f32 %v4930_v6, %v1814_v60  ;;  %v3296_v6 = vpop.permute.xlu0 %3295 }
 0x496   : > { %v5102_v25 = vand.u32 4294901760, %v3296_v6 }
 0x497   : > { %v5070_v63 = vadd.f32 %v1816_v62, %v1811_v61 }
 0x498   : > { %v3379_v27 = vsub.f32 %v3296_v6, %v5102_v25 }
 0x499   : > { %1818 = vxpose.xlu0.b32.start.end [1/1] (short) (narrow) %v5070_v63, 8  ;;  %v2300_v34 = vsel %vm411_vm1, %v5070_v63, 0 }
 0x49a   : > { %v3380_v30 = vand.u32 4294901760, %v3379_v27  ;;  %v2368_v38 = vand.u32 4294901760, %v2300_v34 }
 0x49c   : > { %v3381_v32 = vsub.f32 %v3379_v27, %v3380_v30  ;;  %v2369_v40 = vsub.f32 %v2300_v34, %v2368_v38 }
 0x49e   : > { %v3382_v35 = vand.u32 4294901760, %v3381_v32 }
 0x4c2   : > { %4399 = vset.pattern.permute.xlu0 %v4633_v43  ;;  %v2370_v43 = vand.u32 4294901760, %v2369_v40 }
 0x4c4   : > { %v2371_v42 = vsub.f32 %v2369_v40, %v2370_v43 }
 0x4c6   : > { %v2372_v45 = vand.u32 4294901760, %v2371_v42 }
 0x507   : > { %v2825_v3 = vpop.trf.xlu1 }
 0x508   : > { %v2846_v4 = vsel %vm411_vm1, %v2825_v3, 0 }
 0x509   : > { %v2914_v5 = vand.u32 4294901760, %v2846_v4 }
 0x50b   : > { %v2915_v8 = vsub.f32 %v2846_v4, %v2914_v5 }
 0x50d   : > { %v2916_v12 = vand.u32 4294901760, %v2915_v8 }
 0x50f   : > { %v2917_v2 = vsub.f32 %v2915_v8, %v2916_v12 }
 0x511   : > { %v2918_v10 = vand.u32 4294901760, %v2917_v2 }
 0x513   : > { %4179 = vmatmul.mubr.f32.vlgmr.msra.gmra.mrb[4].mxu0 %v2918_v10 }
 0x514   : > { %4182 = vmatpush3.msra.mxu0 %v2929_v11  ;;  %4183 = vmatprep.mubr.msk.f32.mxu0 %vm4629_vm0, %v4628_v0 }
 0x515   : > { %4186 = vmatprep.subr.mxu0 %v4628_v0 }
 0x519   : > { %v1834_v14 = vpop.trf.xlu0 }
 0x51a   : > { %v1851_v16 = vsel %vm411_vm1, %v1834_v14, 0 }
 0x51b   : > { %v5081_v17 = vand.u32 4294901760, %v1851_v16  ;;  %4184 = vmatmul.mubr.f32.vlgmr.msra.gmra.mrb[4].mxu0 %v2914_v5 }
 0x51c   : > { %4187 = vmatpush3.msra.mxu0 %v2926_v1  ;;  %4188 = vmatprep.mubr.msk.f32.mxu0 %vm4629_vm0, %v4628_v0 }
 0x51d   : > { %v1920_v18 = vsub.f32 %v1851_v16, %v5081_v17  ;;  %4191 = vmatprep.subr.mxu0 %v4628_v0 }
 0x51f   : > { %v1921_v20 = vand.u32 4294901760, %v1920_v18 }
 0x521   : > { %v1922_v21 = vsub.f32 %v1920_v18, %v1921_v20 }
 0x523   : > { %v1923_v23 = vand.u32 4294901760, %v1922_v21  ;;  %4189 = vmatmul.mubr.f32.vlgmr.msra.gmra.mrb[4].mxu0 %v2915_v8 }
 0x524   : > { %4192 = vmatpush3.msra.mxu0 %v5063_v55  ;;  %4193 = vmatprep.mubr.msk.f32.mxu0 %vm4629_vm0, %v4628_v0 }
 0x525   : > { %4119 = vmatmul.mubr.f32.vlgmr.msra.gmra.mrb[4].mxu1 %v1923_v23  ;;  %4196 = vmatprep.subr.mxu0 %v4628_v0 }
 0x526   : > { %4122 = vmatpush3.msra.mxu1 %v1934_v22  ;;  %4123 = vmatprep.mubr.msk.f32.mxu1 %vm4629_vm0, %v4628_v0 }
 0x527   : > { %4126 = vmatprep.subr.mxu1 %v4628_v0 }
 0x52b   : > { %4194 = vmatmul.mubr.f32.vlgmr.msra.gmra.mrb[4].mxu0 %v2916_v12 }
 0x52c   : > { %4197 = vmatpush3.msra.mxu0 %v2927_v7  ;;  %4198 = vmatprep.mubr.msk.f32.mxu0 %vm4629_vm0, %v4628_v0 }
 0x52d   : > { %4124 = vmatmul.mubr.f32.vlgmr.msra.gmra.mrb[4].mxu1 %v5081_v17  ;;  %4201 = vmatprep.subr.mxu0 %v4628_v0 }
 0x52e   : > { %4127 = vmatpush3.msra.mxu1 %v1931_v13  ;;  %4128 = vmatprep.mubr.msk.f32.mxu1 %vm4629_vm0, %v4628_v0 }
 0x52f   : > { %4131 = vmatprep.subr.mxu1 %v4628_v0 }
 0x533   : > { %4199 = vmatmul.mubr.f32.vlgmr.msra.gmra.mrb[4].mxu0 %v2914_v5 }
 0x534   : > { %4202 = vmatpush3.msra.mxu0 %v5063_v55  ;;  %4203 = vmatprep.mubr.msk.f32.mxu0 %vm4629_vm0, %v4628_v0 }
 0x535   : > { %4129 = vmatmul.mubr.f32.vlgmr.msra.gmra.mrb[4].mxu1 %v1920_v18  ;;  %4206 = vmatprep.subr.mxu0 %v4628_v0 }
 0x536   : > { %4132 = vmatpush3.msra.mxu1 %v5048_v29  ;;  %4133 = vmatprep.mubr.msk.f32.mxu1 %vm4629_vm0, %v4628_v0 }
 0x537   : > { %4136 = vmatprep.subr.mxu1 %v4628_v0 }
 0x53b   : > { %4204 = vmatmul.mubr.f32.vlgmr.msra.gmra.mrb[4].mxu0 %v2914_v5 }
 0x53c   : > { %4207 = vmatpush3.msra.mxu0 %v5102_v25  ;;  %4208 = vmatprep.mubr.msk.f32.mxu0 %vm4629_vm0, %v4628_v0 }
 0x53d   : > { %4134 = vmatmul.mubr.f32.vlgmr.msra.gmra.mrb[4].mxu1 %v1921_v20  ;;  %4211 = vmatprep.subr.mxu0 %v4628_v0 }
 0x53e   : > { %4137 = vmatpush3.msra.mxu1 %v1932_v15  ;;  %4138 = vmatprep.mubr.msk.f32.mxu1 %vm4629_vm0, %v4628_v0 }
 0x53f   : > { %4141 = vmatprep.subr.mxu1 %v4628_v0 }
 0x543   : > { %4209 = vmatmul.mubr.f32.vlgmr.msra.gmra.mrb[4].mxu0 %v3371_v36 }
 0x544   : > { %4212 = vmatpush3.msra.mxu0 %v3382_v35  ;;  %4213 = vmatprep.mubr.msk.f32.mxu0 %vm4629_vm0, %v4628_v0 }
 0x545   : > { %4139 = vmatmul.mubr.f32.vlgmr.msra.gmra.mrb[4].mxu1 %v5081_v17  ;;  %4216 = vmatprep.subr.mxu0 %v4628_v0 }
 0x546   : > { %4142 = vmatpush3.msra.mxu1 %v5048_v29  ;;  %4143 = vmatprep.mubr.msk.f32.mxu1 %vm4629_vm0, %v4628_v0  ;;  %v2382_v29 = vsub.f32 %v2380_v39, %v2381_v41 }
 0x547   : > { %4146 = vmatprep.subr.mxu1 %v4628_v0 }
 0x548   : > { %v2383_v44 = vand.u32 4294901760, %v2382_v29 }
 0x54b   : > { %4214 = vmatmul.mubr.f32.vlgmr.msra.gmra.mrb[4].mxu0 %v5104_v26 }
 0x54c   : > { %4217 = vmatpush3.msra.mxu0 %v3379_v27  ;;  %4218 = vmatprep.mubr.msk.f32.mxu0 %vm4629_vm0, %v4628_v0 }
 0x54d   : > { %4144 = vmatmul.mubr.f32.vlgmr.msra.gmra.mrb[4].mxu1 %v5081_v17  ;;  %4221 = vmatprep.subr.mxu0 %v4628_v0 }
 0x54e   : > { %4147 = vmatpush3.msra.mxu1 %v2303_v37  ;;  %4148 = vmatprep.mubr.msk.f32.mxu1 %vm4629_vm0, %v4628_v0 }
 0x54f   : > { %4151 = vmatprep.subr.mxu1 %v4628_v0 }
 0x553   : > { %4219 = vmatmul.mubr.f32.vlgmr.msra.gmra.mrb[4].mxu0 %v3368_v28 }
 0x554   : > { %4222 = vmatpush3.msra.mxu0 %v5102_v25  ;;  %4223 = vmatprep.mubr.msk.f32.mxu0 %vm4629_vm0, %v4628_v0 }
 0x555   : > { %4149 = vmatmul.mubr.f32.vlgmr.msra.gmra.mrb[4].mxu1 %v2372_v45  ;;  %4226 = vmatprep.subr.mxu0 %v4628_v0 }
 0x556   : > { %4152 = vmatpush3.msra.mxu1 %v2383_v44  ;;  %4153 = vmatprep.mubr.msk.f32.mxu1 %vm4629_vm0, %v4628_v0 }
 0x557   : > { %4156 = vmatprep.subr.mxu1 %v4628_v0 }
 0x55b   : > { %4224 = vmatmul.mubr.f32.vlgmr.msra.gmra.mrb[4].mxu0 %v3369_v31 }
 0x55c   : > { %4227 = vmatpush3.msra.mxu0 %v3380_v30  ;;  %4228 = vmatprep.mubr.msk.f32.mxu0 %vm4629_vm0, %v4628_v0 }
 0x55d   : > { %4154 = vmatmul.mubr.f32.vlgmr.msra.gmra.mrb[4].mxu1 %v2368_v38  ;;  %4231 = vmatprep.subr.mxu0 %v4628_v0 }
 0x55e   : > { %4157 = vmatpush3.msra.mxu1 %v2380_v39  ;;  %4158 = vmatprep.mubr.msk.f32.mxu1 %vm4629_vm0, %v4628_v0 }
 0x55f   : > { %4161 = vmatprep.subr.mxu1 %v4628_v0 }
 0x563   : > { %4229 = vmatmul.mubr.f32.vlgmr.msra.gmra.mrb[4].mxu0 %v5104_v26 }
 0x564   : > { %4232 = vmatpush3.msra.mxu0 %v5102_v25  ;;  %4233 = vmatprep.mubr.msk.f32.mxu0 %vm4629_vm0, %v4628_v0 }
 0x565   : > { %4159 = vmatmul.mubr.f32.vlgmr.msra.gmra.mrb[4].mxu1 %v2369_v40 }
 0x566   : > { %4162 = vmatpush3.msra.mxu1 %v2303_v37  ;;  %4163 = vmatprep.mubr.msk.f32.mxu1 %vm4629_vm0, %v4628_v0 }
 0x567   : > { %4166 = vmatprep.subr.mxu1 %v4628_v0 }
 0x56b   : > { %4234 = vmatmul.mubr.f32.vlgmr.msra.gmra.mrb[4].mxu0 %v5104_v26 }
 0x56d   : > { %4164 = vmatmul.mubr.f32.vlgmr.msra.gmra.mrb[4].mxu1 %v2370_v43 }
 0x56e   : > { %4167 = vmatpush3.msra.mxu1 %v2381_v41  ;;  %4168 = vmatprep.mubr.msk.f32.mxu1 %vm4629_vm0, %v4628_v0 }
 0x56f   : > { %4171 = vmatprep.subr.mxu1 %v4628_v0 }
 0x575   : > { %4169 = vmatmul.mubr.f32.vlgmr.msra.gmra.mrb[4].mxu1 %v2368_v38 }
 0x576   : > { %4172 = vmatpush3.msra.mxu1 %v2303_v37  ;;  %4173 = vmatprep.mubr.msk.f32.mxu1 %vm4629_vm0, %v4628_v0 }
 0x57d   : > { %4174 = vmatmul.mubr.f32.vlgmr.msra.gmra.mrb[4].mxu1 %v2368_v38 }
 0x63e   : > { %v3743_v46 = vpop.f32.mrb[4].mxu0 }
 0x63f   : > { %3748 = vrot.lane.b32.xlu0 %v3743_v46, %s4634_s14  ;;  %v4235_v47 = vpop.f32.mrb[5].mxu0 }
 0x650   : > { %v2744_v48 = vpop.f32.mrb[4].mxu1 }
 0x651   : > { %v4175_v49 = vpop.f32.mrb[5].mxu1 }
 0x6b1   : > { %v3749_v50 = vpop.permute.xlu0 %3748 }
 0x6b2   : > { %v3751_v0 = vsel %vm1761_vm2, %v2744_v48, %v3749_v50 }
 0x6b3   : > { %3753 = vst.msk [vmem:[%s400_s19] sm:$0xff] %vm3752_vm6, %v3751_v0 }
 0x6b4   : > { %4545 = shalt.err (!%p4542_p5)
}
 0x6b5   : > { %s4546_s29 = scalar_lea.hbm %s5174_s11, 128  ;;  %s4550_s30 = scalar_lea.hbm %s5230_s6, 256 }
 0x6b6   : > { %p4547_p0 = scmp.ne.s32.totalorder %s5174_s11, %s4546_s29  ;;  %p4551_p12 = scmp.lt.u32.totalorder %s5174_s11, %s5230_s6 }
 0x6b7   : > { %p4552_p10 = scmp.lt.u32.totalorder %s4550_s30, %s4546_s29  ;;  %p4554_p7 = scmp.lt.u32.totalorder %s4546_s29, %s5174_s11 }
 0x6b8   : > { %p4548_p3 = pnand %p4547_p0, %p5264_p8 }
 0x6b9   : > { %p4553_p4 = por %p4552_p10, %p4551_p12 }
 0x6ba   : > { %p4549_p1 = pneg %p4548_p3 }
 0x6bb   : > { %p4555_p9 = por %p4554_p7, %p4553_p4 }
 0x6bd   : > { %p4556_p6 = pnand %p4555_p9, %p4549_p1 }
 0x6bf   : > { %4559 = shalt.err (!%p4556_p6)
}
 0x6c0   : > { %4317 = dma.vmem_to_hbm [thread:$0]  (%p5264_p8), %s5176_s23, 128, %s5174_s11, %s3755_s8  }
 0x6c1 PF: > { %s5265_s7 = sld [smem:[#allocation15_spill]]  ;;  %s5266_s25 = sld [smem:[#allocation21_spill]] }
 0x6c2   : > { %s5267_s26 = sld [smem:[#allocation18_spill]] }
 0x6c7   : > { %s3781_s15 = sand.u32 1, %s5265_s7   ;;  %p5268_p13 = scmp.ne.s32.totalorder %s5266_s25, 0 }
 0x6c8   : > { %p5269_p11 = scmp.ge.s32.totalorder %s5267_s26, 2  ;;  %s3782_s13 = scalar_lea.sflag [#allocation4], %s3781_s15 }
 0x6ca   : > { %p4333_p2 = pnand %p5269_p11, %p5268_p13 }
 0x6cc   : > { %4597 = dma.done.wait (!%p4333_p2), %s3782_s13, 128  }
 0x6cd   : > { %4599 = vsyncadd (!%p4333_p2), %s3782_s13, 4294967168  ;;  %s28_s26 = sadd.s32 1, %s5267_s26   ;;  %s5270_s14 = sld [smem:[#allocation16_spill]] }
 0x6ce   : > { %p25_p5 = scmp.ge.s32.totalorder %s28_s26, 4   ;;  %s5271_s23 = sld [smem:[#allocation20_spill]] }
 0x6cf   : > { %s5272_s24 = sld [smem:[#allocation17_spill]]  ;;  %s5273_s25 = sld [smem:[#allocation19_spill]] }
 0x6d0   : > { %s5274_s21 = smov %s4606_s22  ;;  %27 = sbr.rel (!%p25_p5) target bundleno = 12 (0xc), region = 128 }
 0x6d3   : > { %s5275_s22 = smov %s5270_s14 }
 0x6d7   :  { %3787 = vsyncpa [#allocation3], 1 }
 0x6d8   :  { %3789 = vsyncpa [#allocation3 + $0x1], 1 }
 0x6d9   :  { %3790 = vsyncpa [#allocation6], 1 }
 0x6da   :  { %3792 = vsyncpa [#allocation6 + $0x1], 1 }
 0x6db   :  { %3793 = vsyncpa [#allocation9], 1 }
 0x6dc   :  { %3795 = vsyncpa [#allocation9 + $0x1], 1 }
 0x6dd   :  { %3796 = vsyncpa [#allocation4], 1 }
 0x6de   :  { %3798 = vsyncpa [#allocation4 + $0x1], 1 }

</bundles_post_ra>
